<compile_context>
chip_gen: v7x
topology: tpu7x:2x2x1
jax: 0.10.0
libtpu: 0.0.40
codegen_flags: <defaults>
</compile_context>

<pallas_src>
import jax
import jax.numpy as jnp
from jax.experimental import pallas as pl
from jax.experimental.pallas import tpu as pltpu

USE_BF16_MXU = True   # MXU has no native f32 path; bf16 operands + f32 accumulate.


def token_mixer_kernel(x_ref, w_m1_ref, w_0_ref, w_p1_ref, wp_ref, bc_ref, o_ref):
    """One grid step: (bt, C, L) channels-first block -> (bt, C, L).

    Depthwise Conv1d(k=3, padding=1, groups=C): lane rolls (XLU) + edge masks.
    Pointwise Conv1d(k=1): one (C,C)x(C,L) MXU matmul per batch element.
    Depthwise bias is pre-folded into `bc` in the wrapper.
    """
    bt, C, L = x_ref.shape
    w_m1 = w_m1_ref[...]          # (C, 1) per-channel taps, lane-broadcast
    w_0 = w_0_ref[...]
    w_p1 = w_p1_ref[...]
    wp = wp_ref[...]              # (C_out, C_in); bf16 when USE_BF16_MXU
    bc = bc_ref[...]              # (C, 1) combined bias = Wp @ bd + bp

    lane = jax.lax.broadcasted_iota(jnp.int32, (C, L), 1)
    is_first = lane == 0
    is_last = lane == L - 1

    for b in range(bt):           # short static loop; unrolled for the scheduler
        xc = x_ref[b]                                                # (C, L) f32
        # x[:, l-1] with zero padding at l == 0 (non-negative lane roll + mask).
        h_prev = jnp.where(is_first, 0.0, pltpu.roll(xc, shift=1, axis=1))
        # x[:, l+1] with zero padding at l == L-1.
        h_next = jnp.where(is_last, 0.0, pltpu.roll(xc, shift=L - 1, axis=1))
        y = w_m1 * h_prev + w_0 * xc + w_p1 * h_next                 # (C, L) f32
        if USE_BF16_MXU:
            y = y.astype(jnp.bfloat16)
        z = jnp.dot(wp, y, preferred_element_type=jnp.float32) + bc  # (C, L) f32
        o_ref[b] = z.astype(o_ref.dtype)


def _pick_bt(B, C, L, itemsize=4, budget_bytes=8 << 20):
    """Largest batch tile whose double-buffered in+out blocks fit `budget_bytes`
    (conservative for v5e's 16 MiB scoped VMEM / v7x's 64 MiB physical),
    preferring grid >= 2 so both v7x TensorCores get an equal share."""
    divisors = [bt for bt in range(1, B + 1) if B % bt == 0]
    fits = [bt for bt in divisors if 4 * bt * C * L * itemsize <= budget_bytes]
    if not fits:
        return 1
    multi = [bt for bt in fits if B // bt >= 2]
    return max(multi) if multi else max(fits)


def token_mixer_forward(x, params, *, bt=None):
    """TokenMixer('dsc') forward.  x: (B, C, L) channels-first (PyTorch layout)."""
    B, C, L = x.shape
    assert C % 8 == 0 and L % 128 == 0, "demo keeps (C, L) tile-aligned"
    if bt is None:
        bt = _pick_bt(B, C, L, jnp.dtype(x.dtype).itemsize)
    assert B % bt == 0

    wd = params["depth_w"]                                   # (C, 3) depthwise taps
    w_m1 = wd[:, 0:1]                                        # (C, 1) pre-split taps
    w_0 = wd[:, 1:2]
    w_p1 = wd[:, 2:3]
    wp = params["point_w"]                                   # (C_out, C_in)
    # Fold depthwise bias through pointwise conv: Wp@(y+bd)+bp == Wp@y + (Wp@bd+bp).
    bc = (wp @ params["depth_b"] + params["point_b"])[:, None]   # (C, 1) f32
    if USE_BF16_MXU:
        wp = wp.astype(jnp.bfloat16)  # cast once in wrapper, not per grid step

    def const_spec(shape):
        return pl.BlockSpec(shape, lambda i: (0, 0))         # loop-invariant weights

    return pl.pallas_call(
        token_mixer_kernel,
        out_shape=jax.ShapeDtypeStruct((B, C, L), x.dtype),
        grid_spec=pltpu.PrefetchScalarGridSpec(
            num_scalar_prefetch=0,
            grid=(B // bt,),
            in_specs=[
                pl.BlockSpec((bt, C, L), lambda i: (i, 0, 0)),   # x, channels-first
                const_spec((C, 1)), const_spec((C, 1)), const_spec((C, 1)),
                const_spec((C, C)),                              # pointwise weight
                const_spec((C, 1)),                              # combined bias
            ],
            out_specs=pl.BlockSpec((bt, C, L), lambda i: (i, 0, 0)),
        ),
        compiler_params=pltpu.CompilerParams(
            dimension_semantics=("parallel",)),
    )(x, w_m1, w_0, w_p1, wp, bc)


def token_mixer_ref(x, params):
    """Pure-JAX reference mirroring the PyTorch TokenMixer('dsc') forward."""
    wd, bd = params["depth_w"], params["depth_b"]
    wp, bp = params["point_w"], params["point_b"]
    xp = jnp.pad(x, ((0, 0), (0, 0), (1, 1)))                # Conv1d padding=1 along L
    y = (wd[:, 0][None, :, None] * xp[:, :, :-2]
         + wd[:, 1][None, :, None] * xp[:, :, 1:-1]
         + wd[:, 2][None, :, None] * xp[:, :, 2:]
         + bd[None, :, None])
    return jnp.einsum('oc,bcl->bol', wp, y) + bp[None, :, None]


if __name__ == "__main__":
    # Small-but-aligned demo shapes: batch=8, ch_in=128 channels, length=128.
    B, C, L = 8, 128, 128

    key = jax.random.PRNGKey(0)
    k_x, k_dw, k_db, k_pw, k_pb = jax.random.split(key, 5)

    # PyTorch-default-like uniform(-1/sqrt(fan_in), 1/sqrt(fan_in)) init.
    db = 1.0 / (3.0 ** 0.5)          # depthwise fan_in = (C/groups)*k = 3
    pb = 1.0 / (C ** 0.5)            # pointwise fan_in = C*1
    params = dict(
        depth_w=jax.random.uniform(k_dw, (C, 3), jnp.float32, -db, db),
        depth_b=jax.random.uniform(k_db, (C,), jnp.float32, -db, db),
        point_w=jax.random.uniform(k_pw, (C, C), jnp.float32, -pb, pb),
        point_b=jax.random.uniform(k_pb, (C,), jnp.float32, -pb, pb),
    )
    x = jax.random.normal(k_x, (B, C, L), jnp.float32)

    out = token_mixer_forward(x, params)
    jax.block_until_ready(out)

    ref = token_mixer_ref(x, params)
    tol = 3e-2 if USE_BF16_MXU else 1e-3
    err = float(jnp.max(jnp.abs(out - ref)))
    assert jnp.allclose(out, ref, rtol=tol, atol=tol), f"max abs err {err}"
    print("KERNEL_OK")
</pallas_src>

<mosaic_0001>
module attributes {stable_mosaic.version = 11 : i64} {
  func.func @token_mixer_kernel(%arg0: i32, %arg1: memref<4x128x128xf32, #tpu.memory_space<vmem>>, %arg2: memref<128x1xf32, #tpu.memory_space<vmem>>, %arg3: memref<128x1xf32, #tpu.memory_space<vmem>>, %arg4: memref<128x1xf32, #tpu.memory_space<vmem>>, %arg5: memref<128x128xbf16, #tpu.memory_space<vmem>>, %arg6: memref<128x1xf32, #tpu.memory_space<vmem>>, %arg7: memref<4x128x128xf32, #tpu.memory_space<vmem>>) attributes {dimension_semantics = [#tpu.dimension_semantics<parallel>], iteration_bounds = array<i64: 2>, scalar_prefetch = 0 : i64, scratch_operands = 0 : i64, tpu.core_type = #tpu.core_type<tc>, window_params = [{transform_indices = @transform_0, window_bounds = array<i64: 4, 128, 128>}, {pipeline_mode = #tpu.pipeline_mode<synchronous>, transform_indices = @transform_1, window_bounds = array<i64: 128, 1>}, {pipeline_mode = #tpu.pipeline_mode<synchronous>, transform_indices = @transform_2, window_bounds = array<i64: 128, 1>}, {pipeline_mode = #tpu.pipeline_mode<synchronous>, transform_indices = @transform_3, window_bounds = array<i64: 128, 1>}, {pipeline_mode = #tpu.pipeline_mode<synchronous>, transform_indices = @transform_4, window_bounds = array<i64: 128, 128>}, {pipeline_mode = #tpu.pipeline_mode<synchronous>, transform_indices = @transform_5, window_bounds = array<i64: 128, 1>}, {transform_indices = @transform_6, window_bounds = array<i64: 4, 128, 128>}]} {
    %c0 = arith.constant 0 : index
    %c0_0 = arith.constant 0 : index
    %0 = vector.load %arg2[%c0, %c0_0] : memref<128x1xf32, #tpu.memory_space<vmem>>, vector<128x1xf32>
    %c0_1 = arith.constant 0 : index
    %c0_2 = arith.constant 0 : index
    %1 = vector.load %arg3[%c0_1, %c0_2] : memref<128x1xf32, #tpu.memory_space<vmem>>, vector<128x1xf32>
    %c0_3 = arith.constant 0 : index
    %c0_4 = arith.constant 0 : index
    %2 = vector.load %arg4[%c0_3, %c0_4] : memref<128x1xf32, #tpu.memory_space<vmem>>, vector<128x1xf32>
    %c0_5 = arith.constant 0 : index
    %c0_6 = arith.constant 0 : index
    %3 = vector.load %arg5[%c0_5, %c0_6] : memref<128x128xbf16, #tpu.memory_space<vmem>>, vector<128x128xbf16>
    %c0_7 = arith.constant 0 : index
    %c0_8 = arith.constant 0 : index
    %4 = vector.load %arg6[%c0_7, %c0_8] : memref<128x1xf32, #tpu.memory_space<vmem>>, vector<128x1xf32>
    %5 = tpu.iota {dimensions = array<i32: 1>} : vector<128x128xi32>
    %c0_i32 = arith.constant 0 : i32
    %6 = vector.broadcast %c0_i32 : i32 to vector<128x128xi32>
    %7 = arith.cmpi eq, %5, %6 : vector<128x128xi32>
    %c127_i32 = arith.constant 127 : i32
    %8 = vector.broadcast %c127_i32 : i32 to vector<128x128xi32>
    %9 = arith.cmpi eq, %5, %8 : vector<128x128xi32>
    %c0_9 = arith.constant 0 : index
    %c0_10 = arith.constant 0 : index
    %c0_11 = arith.constant 0 : index
    %10 = vector.load %arg1[%c0_9, %c0_10, %c0_11] : memref<4x128x128xf32, #tpu.memory_space<vmem>>, vector<1x128x128xf32>
    %11 = vector.shape_cast %10 : vector<1x128x128xf32> to vector<128x128xf32>
    %c1_i32 = arith.constant 1 : i32
    %12 = tpu.dynamic_rotate %11 by %c1_i32 dim 1 : vector<128x128xf32>, i32 -> vector<128x128xf32>
    %cst = arith.constant 0.000000e+00 : f32
    %13 = vector.broadcast %cst : f32 to vector<128x128xf32>
    %14 = arith.select %7, %13, %12 : vector<128x128xi1>, vector<128x128xf32>
    %c127_i32_12 = arith.constant 127 : i32
    %15 = tpu.dynamic_rotate %11 by %c127_i32_12 dim 1 : vector<128x128xf32>, i32 -> vector<128x128xf32>
    %cst_13 = arith.constant 0.000000e+00 : f32
    %16 = vector.broadcast %cst_13 : f32 to vector<128x128xf32>
    %17 = arith.select %9, %16, %15 : vector<128x128xi1>, vector<128x128xf32>
    %18 = vector.broadcast %0 : vector<128x1xf32> to vector<128x128xf32>
    %19 = arith.mulf %18, %14 : vector<128x128xf32>
    %20 = vector.broadcast %1 : vector<128x1xf32> to vector<128x128xf32>
    %21 = arith.mulf %20, %11 : vector<128x128xf32>
    %22 = arith.addf %19, %21 : vector<128x128xf32>
    %23 = vector.broadcast %2 : vector<128x1xf32> to vector<128x128xf32>
    %24 = arith.mulf %23, %17 : vector<128x128xf32>
    %25 = arith.addf %22, %24 : vector<128x128xf32>
    %26 = arith.truncf %25 : vector<128x128xf32> to vector<128x128xbf16>
    %cst_14 = arith.constant dense<0.000000e+00> : vector<128x128xf32>
    %27 = tpu.matmul %3, %26, %cst_14 {dimension_numbers = #tpu.dot_dimension_numbers<[1], [0], [0], [1], [0, 0, 1, 1], [], []>} : vector<128x128xbf16>, vector<128x128xbf16>, vector<128x128xf32> -> vector<128x128xf32>
    %28 = vector.broadcast %4 : vector<128x1xf32> to vector<128x128xf32>
    %29 = arith.addf %27, %28 : vector<128x128xf32>
    %c0_15 = arith.constant 0 : index
    %c0_16 = arith.constant 0 : index
    %c0_17 = arith.constant 0 : index
    %30 = vector.load %arg7[%c0_15, %c0_16, %c0_17] : memref<4x128x128xf32, #tpu.memory_space<vmem>>, vector<1x128x128xf32>
    %31 = vector.shape_cast %30 : vector<1x128x128xf32> to vector<128x128xf32>
    %32 = vector.shape_cast %29 : vector<128x128xf32> to vector<1x128x128xf32>
    tpu.vector_store %arg7[%c0_15, %c0_16, %c0_17], %32 {strides = array<i32>} : memref<4x128x128xf32, #tpu.memory_space<vmem>>, vector<1x128x128xf32>,
    %c1 = arith.constant 1 : index
    %c0_18 = arith.constant 0 : index
    %c0_19 = arith.constant 0 : index
    %33 = vector.load %arg1[%c1, %c0_18, %c0_19] : memref<4x128x128xf32, #tpu.memory_space<vmem>>, vector<1x128x128xf32>
    %34 = vector.shape_cast %33 : vector<1x128x128xf32> to vector<128x128xf32>
    %c1_i32_20 = arith.constant 1 : i32
    %35 = tpu.dynamic_rotate %34 by %c1_i32_20 dim 1 : vector<128x128xf32>, i32 -> vector<128x128xf32>
    %cst_21 = arith.constant 0.000000e+00 : f32
    %36 = vector.broadcast %cst_21 : f32 to vector<128x128xf32>
    %37 = arith.select %7, %36, %35 : vector<128x128xi1>, vector<128x128xf32>
    %c127_i32_22 = arith.constant 127 : i32
    %38 = tpu.dynamic_rotate %34 by %c127_i32_22 dim 1 : vector<128x128xf32>, i32 -> vector<128x128xf32>
    %cst_23 = arith.constant 0.000000e+00 : f32
    %39 = vector.broadcast %cst_23 : f32 to vector<128x128xf32>
    %40 = arith.select %9, %39, %38 : vector<128x128xi1>, vector<128x128xf32>
    %41 = vector.broadcast %0 : vector<128x1xf32> to vector<128x128xf32>
    %42 = arith.mulf %41, %37 : vector<128x128xf32>
    %43 = vector.broadcast %1 : vector<128x1xf32> to vector<128x128xf32>
    %44 = arith.mulf %43, %34 : vector<128x128xf32>
    %45 = arith.addf %42, %44 : vector<128x128xf32>
    %46 = vector.broadcast %2 : vector<128x1xf32> to vector<128x128xf32>
    %47 = arith.mulf %46, %40 : vector<128x128xf32>
    %48 = arith.addf %45, %47 : vector<128x128xf32>
    %49 = arith.truncf %48 : vector<128x128xf32> to vector<128x128xbf16>
    %cst_24 = arith.constant dense<0.000000e+00> : vector<128x128xf32>
    %50 = tpu.matmul %3, %49, %cst_24 {dimension_numbers = #tpu.dot_dimension_numbers<[1], [0], [0], [1], [0, 0, 1, 1], [], []>} : vector<128x128xbf16>, vector<128x128xbf16>, vector<128x128xf32> -> vector<128x128xf32>
    %51 = vector.broadcast %4 : vector<128x1xf32> to vector<128x128xf32>
    %52 = arith.addf %50, %51 : vector<128x128xf32>
    %c1_25 = arith.constant 1 : index
    %c0_26 = arith.constant 0 : index
    %c0_27 = arith.constant 0 : index
    %53 = vector.load %arg7[%c1_25, %c0_26, %c0_27] : memref<4x128x128xf32, #tpu.memory_space<vmem>>, vector<1x128x128xf32>
    %54 = vector.shape_cast %53 : vector<1x128x128xf32> to vector<128x128xf32>
    %55 = vector.shape_cast %52 : vector<128x128xf32> to vector<1x128x128xf32>
    tpu.vector_store %arg7[%c1_25, %c0_26, %c0_27], %55 {strides = array<i32>} : memref<4x128x128xf32, #tpu.memory_space<vmem>>, vector<1x128x128xf32>,
    %c2 = arith.constant 2 : index
    %c0_28 = arith.constant 0 : index
    %c0_29 = arith.constant 0 : index
    %56 = vector.load %arg1[%c2, %c0_28, %c0_29] : memref<4x128x128xf32, #tpu.memory_space<vmem>>, vector<1x128x128xf32>
    %57 = vector.shape_cast %56 : vector<1x128x128xf32> to vector<128x128xf32>
    %c1_i32_30 = arith.constant 1 : i32
    %58 = tpu.dynamic_rotate %57 by %c1_i32_30 dim 1 : vector<128x128xf32>, i32 -> vector<128x128xf32>
    %cst_31 = arith.constant 0.000000e+00 : f32
    %59 = vector.broadcast %cst_31 : f32 to vector<128x128xf32>
    %60 = arith.select %7, %59, %58 : vector<128x128xi1>, vector<128x128xf32>
    %c127_i32_32 = arith.constant 127 : i32
    %61 = tpu.dynamic_rotate %57 by %c127_i32_32 dim 1 : vector<128x128xf32>, i32 -> vector<128x128xf32>
    %cst_33 = arith.constant 0.000000e+00 : f32
    %62 = vector.broadcast %cst_33 : f32 to vector<128x128xf32>
    %63 = arith.select %9, %62, %61 : vector<128x128xi1>, vector<128x128xf32>
    %64 = vector.broadcast %0 : vector<128x1xf32> to vector<128x128xf32>
    %65 = arith.mulf %64, %60 : vector<128x128xf32>
    %66 = vector.broadcast %1 : vector<128x1xf32> to vector<128x128xf32>
    %67 = arith.mulf %66, %57 : vector<128x128xf32>
    %68 = arith.addf %65, %67 : vector<128x128xf32>
    %69 = vector.broadcast %2 : vector<128x1xf32> to vector<128x128xf32>
    %70 = arith.mulf %69, %63 : vector<128x128xf32>
    %71 = arith.addf %68, %70 : vector<128x128xf32>
    %72 = arith.truncf %71 : vector<128x128xf32> to vector<128x128xbf16>
    %cst_34 = arith.constant dense<0.000000e+00> : vector<128x128xf32>
    %73 = tpu.matmul %3, %72, %cst_34 {dimension_numbers = #tpu.dot_dimension_numbers<[1], [0], [0], [1], [0, 0, 1, 1], [], []>} : vector<128x128xbf16>, vector<128x128xbf16>, vector<128x128xf32> -> vector<128x128xf32>
    %74 = vector.broadcast %4 : vector<128x1xf32> to vector<128x128xf32>
    %75 = arith.addf %73, %74 : vector<128x128xf32>
    %c2_35 = arith.constant 2 : index
    %c0_36 = arith.constant 0 : index
    %c0_37 = arith.constant 0 : index
    %76 = vector.load %arg7[%c2_35, %c0_36, %c0_37] : memref<4x128x128xf32, #tpu.memory_space<vmem>>, vector<1x128x128xf32>
    %77 = vector.shape_cast %76 : vector<1x128x128xf32> to vector<128x128xf32>
    %78 = vector.shape_cast %75 : vector<128x128xf32> to vector<1x128x128xf32>
    tpu.vector_store %arg7[%c2_35, %c0_36, %c0_37], %78 {strides = array<i32>} : memref<4x128x128xf32, #tpu.memory_space<vmem>>, vector<1x128x128xf32>,
    %c3 = arith.constant 3 : index
    %c0_38 = arith.constant 0 : index
    %c0_39 = arith.constant 0 : index
    %79 = vector.load %arg1[%c3, %c0_38, %c0_39] : memref<4x128x128xf32, #tpu.memory_space<vmem>>, vector<1x128x128xf32>
    %80 = vector.shape_cast %79 : vector<1x128x128xf32> to vector<128x128xf32>
    %c1_i32_40 = arith.constant 1 : i32
    %81 = tpu.dynamic_rotate %80 by %c1_i32_40 dim 1 : vector<128x128xf32>, i32 -> vector<128x128xf32>
    %cst_41 = arith.constant 0.000000e+00 : f32
    %82 = vector.broadcast %cst_41 : f32 to vector<128x128xf32>
    %83 = arith.select %7, %82, %81 : vector<128x128xi1>, vector<128x128xf32>
    %c127_i32_42 = arith.constant 127 : i32
    %84 = tpu.dynamic_rotate %80 by %c127_i32_42 dim 1 : vector<128x128xf32>, i32 -> vector<128x128xf32>
    %cst_43 = arith.constant 0.000000e+00 : f32
    %85 = vector.broadcast %cst_43 : f32 to vector<128x128xf32>
    %86 = arith.select %9, %85, %84 : vector<128x128xi1>, vector<128x128xf32>
    %87 = vector.broadcast %0 : vector<128x1xf32> to vector<128x128xf32>
    %88 = arith.mulf %87, %83 : vector<128x128xf32>
    %89 = vector.broadcast %1 : vector<128x1xf32> to vector<128x128xf32>
    %90 = arith.mulf %89, %80 : vector<128x128xf32>
    %91 = arith.addf %88, %90 : vector<128x128xf32>
    %92 = vector.broadcast %2 : vector<128x1xf32> to vector<128x128xf32>
    %93 = arith.mulf %92, %86 : vector<128x128xf32>
    %94 = arith.addf %91, %93 : vector<128x128xf32>
    %95 = arith.truncf %94 : vector<128x128xf32> to vector<128x128xbf16>
    %cst_44 = arith.constant dense<0.000000e+00> : vector<128x128xf32>
    %96 = tpu.matmul %3, %95, %cst_44 {dimension_numbers = #tpu.dot_dimension_numbers<[1], [0], [0], [1], [0, 0, 1, 1], [], []>} : vector<128x128xbf16>, vector<128x128xbf16>, vector<128x128xf32> -> vector<128x128xf32>
    %97 = vector.broadcast %4 : vector<128x1xf32> to vector<128x128xf32>
    %98 = arith.addf %96, %97 : vector<128x128xf32>
    %c3_45 = arith.constant 3 : index
    %c0_46 = arith.constant 0 : index
    %c0_47 = arith.constant 0 : index
    %99 = vector.load %arg7[%c3_45, %c0_46, %c0_47] : memref<4x128x128xf32, #tpu.memory_space<vmem>>, vector<1x128x128xf32>
    %100 = vector.shape_cast %99 : vector<1x128x128xf32> to vector<128x128xf32>
    %101 = vector.shape_cast %98 : vector<128x128xf32> to vector<1x128x128xf32>
    tpu.vector_store %arg7[%c3_45, %c0_46, %c0_47], %101 {strides = array<i32>} : memref<4x128x128xf32, #tpu.memory_space<vmem>>, vector<1x128x128xf32>,
    return
  }
  func.func @transform_0(%arg0: i32) -> (i32, i32, i32) {
    %c0_i32 = arith.constant 0 : i32
    %c0_i32_0 = arith.constant 0 : i32
    %c0_i32_1 = arith.constant 0 : i32
    return %arg0, %c0_i32, %c0_i32_0 : i32, i32, i32
  }
  func.func @transform_1(%arg0: i32) -> (i32, i32) {
    %c0_i32 = arith.constant 0 : i32
    %c0_i32_0 = arith.constant 0 : i32
    %c0_i32_1 = arith.constant 0 : i32
    return %c0_i32, %c0_i32_0 : i32, i32
  }
  func.func @transform_2(%arg0: i32) -> (i32, i32) {
    %c0_i32 = arith.constant 0 : i32
    %c0_i32_0 = arith.constant 0 : i32
    %c0_i32_1 = arith.constant 0 : i32
    return %c0_i32, %c0_i32_0 : i32, i32
  }
  func.func @transform_3(%arg0: i32) -> (i32, i32) {
    %c0_i32 = arith.constant 0 : i32
    %c0_i32_0 = arith.constant 0 : i32
    %c0_i32_1 = arith.constant 0 : i32
    return %c0_i32, %c0_i32_0 : i32, i32
  }
  func.func @transform_4(%arg0: i32) -> (i32, i32) {
    %c0_i32 = arith.constant 0 : i32
    %c0_i32_0 = arith.constant 0 : i32
    %c0_i32_1 = arith.constant 0 : i32
    return %c0_i32, %c0_i32_0 : i32, i32
  }
  func.func @transform_5(%arg0: i32) -> (i32, i32) {
    %c0_i32 = arith.constant 0 : i32
    %c0_i32_0 = arith.constant 0 : i32
    %c0_i32_1 = arith.constant 0 : i32
    return %c0_i32, %c0_i32_0 : i32, i32
  }
  func.func @transform_6(%arg0: i32) -> (i32, i32, i32) {
    %c0_i32 = arith.constant 0 : i32
    %c0_i32_0 = arith.constant 0 : i32
    %c0_i32_1 = arith.constant 0 : i32
    return %arg0, %c0_i32, %c0_i32_0 : i32, i32, i32
  }
}

</mosaic_0001>

<bundles_post_ra>
// kernel: tpu_custom_call.1
= control target key start
LH: loop header
LB: loop body
LE: loop exit
PB: predicated region body
PF: predicated region fallthrough
CT: control target
= control target key end

     0   :  { %11 = vsyncpa [#allocation3], 0  ;;  %s4346_s0 = inlined_call_operand.hbm [shape: f32[8,128,128], index: 0, kind: input, shape index: {}]   ;;  %s4347_s1 = inlined_call_operand.vmem [shape: f32[128,1], index: 1, kind: input, shape index: {}]   ;;  %s4348_s2 = inlined_call_operand.vmem [shape: f32[128,1], index: 2, kind: input, shape index: {}]   ;;  %s4349_s3 = inlined_call_operand.vmem [shape: f32[128,1], index: 3, kind: input, shape index: {}]   ;;  %s4350_s4 = inlined_call_operand.vmem [shape: bf16[128,128], index: 4, kind: input, shape index: {}]   ;;  %s4351_s5 = inlined_call_operand.vmem [shape: f32[128,1], index: 5, kind: input, shape index: {}]   ;;  %s4352_s6 = inlined_call_operand.hbm [shape: f32[8,128,128], index: 6, kind: output, shape index: {}]  }
   0x1   :  { %13 = vsyncpa [#allocation3 + $0x1], 0 }
   0x2   :  { %14 = vsyncpa [#allocation4], 0 }
   0x3   :  { %16 = vsyncpa [#allocation4 + $0x1], 0  ;;  %s2598_s21 = smov 0   ;;  %s2600_s22 = smov 0  }
   0x4   :  { %s2602_s23 = smov 0   ;;  %s2604_s24 = smov 0  }
   0x5 LB: > { %s2619_s25 = sadd.s32 4294967295, %s2552_s24   ;;  %s2072_s26 = sadd.s32 4294967294, %s2552_s24   ;;  %s2552_s24 = sphi %s2604_s24, %s4577_s24   ;;  %s2548_s23 = sphi %s2602_s23, %s4576_s23   ;;  %s2544_s22 = sphi %s2600_s22, %s4575_s22   ;;  %s2540_s21 = sphi %s2598_s21, %s4574_s21  }
   0x6   : > { %s2623_s27 = sadd.s32 1, %s2552_s24   ;;  %s29_s28 = sadd.s32 1, %s2548_s23 }
   0x7   : > { %s26_s29 = ssub.s32 %s2552_s24, %s2623_s27  ;;  %p36_p0 = scmp.ne.s32.totalorder %s2548_s23, %s2544_s22 }
   0x8   : > { %p27_p1 = scmp.eq.s32.totalorder %s26_s29, 0  ;;  %p37_p2 = scmp.eq.s32.totalorder %s2552_s24, 0 }
   0x9   : > { %p42_p3 = scmp.ne.s32.totalorder %s2544_s22, %s2540_s21  ;;  %p43_p4 = scmp.eq.s32.totalorder %s2619_s25, 0 }
   0xa   : > { %s2635_s30 = scalar_select %p27_p1, %s2548_s23, %s29_s28  }
   0xb   : > { %p2637_p5 = por %p37_p2, %p36_p0  ;;  %p2641_p6 = por %p43_p4, %p42_p3 }
   0xc   : > { %p171_p7 = scmp.eq.s32.totalorder %s2619_s25, 1  ;;  %p177_p8 = scmp.eq.s32.totalorder %s2072_s26, 1 }
   0xd   : > { %p2400_p10 = scmp.lt.s32.totalorder %s2552_s24, 2  ;;  %s212_s11 = sand.u32 1, %s2548_s23  }
   0xe   : > { %p2648_p11 = por %p171_p7, %p36_p0  ;;  %p2652_p12 = por %p177_p8, %p42_p3 }
   0xf   : > { %s2193_s12 = sshll.u32 %s2552_s24, 13  ;;  %s2075_s13 = sshll.u32 %s212_s11, 9 }
  0x10   : > { %s4428_s9 = scalar_select %p2648_p11, 1, 0 }
  0x11   : > { %s4429_s10 = scalar_select %p2652_p12, 1, 0 }
  0x12   : > { %s2661_s16 = scalar_lea.hbm %s4346_s0, %s2193_s12  ;;  %s216_s17 = scalar_lea.vmem [#allocation2], %s2075_s13 }
  0x13   : > { %s224_s18 = sshll.u32 %s216_s17, 4  ;;  %p2665_p13 = pnand %p2400_p10, %p2637_p5  ;;  %s2669_s18 = int_to_ptr.vmem [resolvable:$true] %s224_s18 }
  0x14   : > { %s2671_s20 = scalar_lea.sflag [#allocation3], %s212_s11  ;;  %s2456_s26 = scalar_lea.hbm %s2661_s16, 8192 }
  0x15   : > { %p2457_p0 = scmp.ne.s32.totalorder %s2661_s16, %s2456_s26  ;;  %p2458_p1 = pneg %p2665_p13 }
  0x16   : > { %s2461_s7 = scalar_lea.hbm %s4346_s0, 16384  ;;  %p2462_p4 = scmp.lt.u32.totalorder %s2661_s16, %s4346_s0 }
  0x17   : > { %p2459_p2 = pnand %p2458_p1, %p2457_p0  ;;  %p2463_p5 = scmp.lt.u32.totalorder %s2461_s7, %s2456_s26 }
  0x18   : > { %p2465_p8 = scmp.lt.u32.totalorder %s2456_s26, %s2661_s16 }
  0x19   : > { %p2460_p3 = pneg %p2459_p2  ;;  %p2464_p7 = por %p2463_p5, %p2462_p4 }
  0x1b   : > { %p2466_p10 = por %p2465_p8, %p2464_p7 }
  0x1d   : > { %p2467_p9 = pnand %p2466_p10, %p2460_p3 }
  0x1f   : > { %2470 = shalt.err (!%p2467_p9)
}
  0x20   : > { %s2471_s11 = scalar_lea.vmem %s2669_s18, 8192  ;;  %s2554_s14 = smov [#allocation2]  }
  0x21   : > { %p2472_p0 = scmp.ne.s32.totalorder %s2669_s18, %s2471_s11  ;;  %s2476_s15 = sshll.u32 %s2554_s14, 4  ;;  %s2477_s15 = int_to_ptr.vmem [resolvable:$false] %s2476_s15 }
  0x22   : > { %s2478_s17 = scalar_lea.vmem %s2477_s15, 16384  ;;  %p2479_p11 = scmp.lt.s32.totalorder %s2669_s18, %s2477_s15 }
  0x23   : > { %p2474_p2 = pnand %p2472_p0, %p2458_p1  ;;  %p2480_p4 = scmp.lt.s32.totalorder %s2478_s17, %s2471_s11 }
  0x25   : > { %p2475_p12 = pneg %p2474_p2  ;;  %p2481_p5 = por %p2480_p4, %p2479_p11 }
  0x27   : > { %p2482_p7 = pnand %p2481_p5, %p2475_p12 }
  0x29   : > { %2485 = shalt.err (!%p2482_p7)
}
  0x2a   : > { %s2555_s26 = smov 128   ;;  %s2556_s28 = smov 8  }
  0x2b   : > { %2395 = dma.hbm_to_vmem [thread:$0]  (!%p2665_p13), %s2661_s16, 8192, %s2669_s18, %s2671_s20, %s2555_s26, %s2555_s26, %s2556_s28  }
  0x2c   : > { %p2079_p9 = scmp.ge.s32.totalorder %s2552_s24, 1  ;;  %p232_p1 = scmp.lt.s32.totalorder %s2552_s24, 3 }
  0x2e   : > { %p233_p3 = pnand %p2079_p9, %p232_p1 }
  0x30   : > { %236 = sbr.rel (%p233_p3) target bundleno = 804 (0x324), region = 44 }
  0x37   : > { %s2702_s29 = sand.u32 1, %s2544_s22  }
  0x38   : > { %s2080_s7 = sshll.u32 %s2702_s29, 9  ;;  %s239_s12 = scalar_lea.sflag [#allocation3], %s2702_s29 }
  0x39   : > { %s2708_s13 = scalar_lea.vmem [#allocation2], %s2080_s7 }
  0x3a   : > { %2531 = dma.done.wait (%p2641_p6), %s239_s12, 8192  }
  0x3b   : > { %2533 = vsyncadd (%p2641_p6), %s239_s12, 4294959104  ;;  %v2557_v0 = vmov 0   ;;  %v2715_v1 = vld [vmem:[%s2708_s13 + $0x10] sm:$0xff]  ;;  %v2718_v2 = vld [vmem:[%s2708_s13] sm:$0xff]  ;;  %s2558_s16 = smov 1   ;;  %s2559_s8 = smov 127  }
  0x3c   : > { %2442 = vset.pattern.permute.xlu1 %v2557_v0  ;;  %2441 = vset.pattern.permute.xlu0 %v2557_v0  ;;  %v2725_v3 = vld [vmem:[%s2708_s13 + $0x18] sm:$0xff]  ;;  %v2728_v4 = vld [vmem:[%s2708_s13 + $0x8] sm:$0xff]  ;;  %v2738_v6 = vld [vmem:[%s2708_s13 + $0x20] sm:$0xff]  ;;  %s4151_s15 = scalar_lea.vmem [#allocation5], %s2080_s7  ;;  %s2195_s7 = sshll.u32 %s2619_s25, 13 }
  0x3d   : > { %378 = vrot.lane.b32.xlu1 %v2715_v1, %s2558_s16  ;;  %374 = vrot.lane.b32.xlu0 %v2718_v2, %s2558_s16  ;;  %v2735_v5 = vld [vmem:[%s2708_s13 + $0x28] sm:$0xff]  ;;  %v2745_v7 = vld [vmem:[%s2708_s13 + $0x38] sm:$0xff]  ;;  %s1999_s17 = sshll.u32 %s4151_s15, 4  ;;  %s4296_s25 = scalar_lea.hbm %s4352_s6, %s2195_s7  ;;  %s4298_s17 = int_to_ptr.vmem [resolvable:$true] %s1999_s17 }
  0x3e   : > { %v2748_v8 = vld [vmem:[%s2708_s13 + $0x30] sm:$0xff]  ;;  %v2755_v9 = vld [vmem:[%s2708_s13 + $0x48] sm:$0xff]  ;;  %v2758_v10 = vld [vmem:[%s2708_s13 + $0x40] sm:$0xff]  ;;  %s2486_s28 = scalar_lea.vmem %s4298_s17, 8192  ;;  %p4571_p11 = scmp.ne.s32.totalorder %s4428_s9, 0 }
  0x3f   : > { %v2765_v11 = vld [vmem:[%s2708_s13 + $0x58] sm:$0xff]  ;;  %v2768_v12 = vld [vmem:[%s2708_s13 + $0x50] sm:$0xff]  ;;  %v371_v13 = vld [vmem:[%s2708_s13 + $0x68] sm:$0xff]  ;;  %p2487_p6 = scmp.ne.s32.totalorder %s4298_s17, %s2486_s28  ;;  %s2560_s12 = smov [#allocation5]  }
  0x40   : > { %4431 = vst [vmem:[#allocation8_spill] sm:$0xff] %v2765_v11  ;;  %4432 = vst [vmem:[#allocation9_spill] sm:$0xff] %v2768_v12  ;;  %v370_v14 = vld [vmem:[%s2708_s13 + $0x60] sm:$0xff]  ;;  %v373_v15 = vld [vmem:[%s2708_s13 + $0x78] sm:$0xff]  ;;  %s2490_s18 = sshll.u32 %s2560_s12, 4  ;;  %s2491_s18 = int_to_ptr.vmem [resolvable:$false] %s2490_s18 }
  0x41   : > { %380 = vrot.lane.b32.xlu1 %v2725_v3, %s2558_s16  ;;  %376 = vrot.lane.b32.xlu0 %v2728_v4, %s2558_s16  ;;  %v372_v16 = vld [vmem:[%s2708_s13 + $0x70] sm:$0xff]  ;;  %v275_v17 = vld [vmem:[%s4347_s1 + $0x8] sm:$0xff]  ;;  %p2488_p12 = pnand %p2487_p6, %p4571_p11  ;;  %p2493_p8 = scmp.lt.s32.totalorder %s4298_s17, %s2491_s18 }
  0x42   : > { %v274_v18 = vld [vmem:[%s4347_s1] sm:$0xff]  ;;  %v276_v19 = vld [vmem:[%s4347_s1 + $0x10] sm:$0xff]  ;;  %v277_v20 = vld [vmem:[%s4347_s1 + $0x18] sm:$0xff] }
  0x43   : > { %v278_v21 = vld [vmem:[%s4347_s1 + $0x20] sm:$0xff]  ;;  %v279_v22 = vld [vmem:[%s4347_s1 + $0x28] sm:$0xff]  ;;  %v280_v23 = vld [vmem:[%s4347_s1 + $0x30] sm:$0xff]  ;;  %p2489_p13 = pneg %p2488_p12 }
  0x44   : > { %v281_v24 = vld [vmem:[%s4347_s1 + $0x38] sm:$0xff]  ;;  %v282_v25 = vld [vmem:[%s4347_s1 + $0x40] sm:$0xff]  ;;  %v283_v26 = vld [vmem:[%s4347_s1 + $0x48] sm:$0xff] }
  0x45   : > { %384 = vrot.lane.b32.xlu1 %v2735_v5, %s2558_s16  ;;  %382 = vrot.lane.b32.xlu0 %v2738_v6, %s2558_s16  ;;  %v284_v27 = vld [vmem:[%s4347_s1 + $0x50] sm:$0xff]  ;;  %v285_v28 = vld [vmem:[%s4347_s1 + $0x58] sm:$0xff] }
  0x46   : > { %v286_v29 = vld [vmem:[%s4347_s1 + $0x60] sm:$0xff]  ;;  %v287_v30 = vld [vmem:[%s4347_s1 + $0x68] sm:$0xff]  ;;  %v288_v31 = vld [vmem:[%s4347_s1 + $0x70] sm:$0xff] }
  0x47   : > { %v289_v32 = vld [vmem:[%s4347_s1 + $0x78] sm:$0xff]  ;;  %v290_v33 = vld [vmem:[%s4348_s2] sm:$0xff]  ;;  %v291_v34 = vld [vmem:[%s4348_s2 + $0x8] sm:$0xff] }
  0x48   : > { %v306_v35 = vld [vmem:[%s4349_s3] sm:$0xff]  ;;  %v307_v36 = vld [vmem:[%s4349_s3 + $0x8] sm:$0xff]  ;;  %v292_v37 = vld [vmem:[%s4348_s2 + $0x10] sm:$0xff] }
  0x49   : > { %388 = vrot.lane.b32.xlu1 %v2745_v7, %s2558_s16  ;;  %386 = vrot.lane.b32.xlu0 %v2748_v8, %s2558_s16  ;;  %v293_v38 = vld [vmem:[%s4348_s2 + $0x18] sm:$0xff]  ;;  %v308_v39 = vld [vmem:[%s4349_s3 + $0x10] sm:$0xff] }
  0x4a   : > { %v309_v40 = vld [vmem:[%s4349_s3 + $0x18] sm:$0xff]  ;;  %v2883_v41 = vld [vmem:[%s2708_s13 + $0x80] sm:$0xff]  ;;  %v2886_v42 = vld [vmem:[%s2708_s13 + $0x88] sm:$0xff] }
  0x4b   : > { %v294_v43 = vld [vmem:[%s4348_s2 + $0x20] sm:$0xff]  ;;  %v295_v44 = vld [vmem:[%s4348_s2 + $0x28] sm:$0xff]  ;;  %v2921_v53 = vld [vmem:[%s2708_s13 + $0x90] sm:$0xff] }
  0x4c   : > { %v310_v49 = vld [vmem:[%s4349_s3 + $0x20] sm:$0xff]  ;;  %v311_v50 = vld [vmem:[%s4349_s3 + $0x28] sm:$0xff]  ;;  %v2924_v54 = vld [vmem:[%s2708_s13 + $0x98] sm:$0xff] }
  0x4d   : > { %392 = vrot.lane.b32.xlu1 %v2755_v9, %s2558_s16  ;;  %390 = vrot.lane.b32.xlu0 %v2758_v10, %s2558_s16  ;;  %v296_v57 = vld [vmem:[%s4348_s2 + $0x30] sm:$0xff]  ;;  %v297_v58 = vld [vmem:[%s4348_s2 + $0x38] sm:$0xff] }
  0x4e   : > { %v312_v63 = vld [vmem:[%s4349_s3 + $0x30] sm:$0xff]  ;;  %v313_v0 = vld [vmem:[%s4349_s3 + $0x38] sm:$0xff] }
  0x51   : > { %396 = vrot.lane.b32.xlu1 %v2765_v11, %s2558_s16  ;;  %394 = vrot.lane.b32.xlu0 %v2768_v12, %s2558_s16 }
  0x55   : > { %400 = vrot.lane.b32.xlu1 %v371_v13, %s2558_s16  ;;  %398 = vrot.lane.b32.xlu0 %v370_v14, %s2558_s16 }
  0x59   : > { %404 = vrot.lane.b32.xlu1 %v373_v15, %s2558_s16  ;;  %402 = vrot.lane.b32.xlu0 %v372_v16, %s2558_s16 }
  0x5d   : > { %424 = vrot.lane.b32.xlu1 %v2728_v4, %s2559_s8  ;;  %422 = vrot.lane.b32.xlu0 %v2718_v2, %s2559_s8 }
  0x61   : > { %428 = vrot.lane.b32.xlu1 %v2725_v3, %s2559_s8  ;;  %426 = vrot.lane.b32.xlu0 %v2715_v1, %s2559_s8 }
  0x65   : > { %432 = vrot.lane.b32.xlu1 %v2735_v5, %s2559_s8  ;;  %430 = vrot.lane.b32.xlu0 %v2738_v6, %s2559_s8 }
  0x69   : > { %436 = vrot.lane.b32.xlu1 %v2745_v7, %s2559_s8  ;;  %434 = vrot.lane.b32.xlu0 %v2748_v8, %s2559_s8 }
  0x6d   : > { %440 = vrot.lane.b32.xlu1 %v2755_v9, %s2559_s8  ;;  %438 = vrot.lane.b32.xlu0 %v2758_v10, %s2559_s8 }
  0x71   : > { %444 = vrot.lane.b32.xlu1 %v2765_v11, %s2559_s8  ;;  %442 = vrot.lane.b32.xlu0 %v2768_v12, %s2559_s8  ;;  %v3209_v12 = vld [vmem:[%s2708_s13 + $0x188] sm:$0xff] }
  0x72   : > { %4465 = vst [vmem:[#allocation42_spill] sm:$0xff] %v3209_v12 }
  0x75   : > { %448 = vrot.lane.b32.xlu1 %v371_v13, %s2559_s8  ;;  %446 = vrot.lane.b32.xlu0 %v370_v14, %s2559_s8 }
  0x79   : > { %452 = vrot.lane.b32.xlu1 %v373_v15, %s2559_s8  ;;  %450 = vrot.lane.b32.xlu0 %v372_v16, %s2559_s8  ;;  %v2963_v15 = vld [vmem:[%s2708_s13 + $0xa0] sm:$0xff]  ;;  %v2966_v16 = vld [vmem:[%s2708_s13 + $0xa8] sm:$0xff] }
  0x7d   : > { %477 = vperm.xlu1 %2442, %v275_v17   ;;  %472 = vperm.xlu0 %2441, %v274_v18  }
  0x81   : > { %482 = vperm.xlu1 %2442, %v276_v19   ;;  %487 = vperm.xlu0 %2441, %v277_v20   ;;  %v298_v19 = vld [vmem:[%s4348_s2 + $0x40] sm:$0xff]  ;;  %v299_v20 = vld [vmem:[%s4348_s2 + $0x48] sm:$0xff] }
  0x85   : > { %492 = vperm.xlu1 %2442, %v278_v21   ;;  %497 = vperm.xlu0 %2441, %v279_v22  }
  0x89   : > { %502 = vperm.xlu1 %2442, %v280_v23   ;;  %507 = vperm.xlu0 %2441, %v281_v24  }
  0x8d   : > { %512 = vperm.xlu1 %2442, %v282_v25   ;;  %517 = vperm.xlu0 %2441, %v283_v26   ;;  %v314_v25 = vld [vmem:[%s4349_s3 + $0x40] sm:$0xff]  ;;  %v315_v26 = vld [vmem:[%s4349_s3 + $0x48] sm:$0xff] }
  0x91   : > { %522 = vperm.xlu1 %2442, %v284_v27   ;;  %527 = vperm.xlu0 %2441, %v285_v28  }
  0x95   : > { %532 = vperm.xlu1 %2442, %v286_v29   ;;  %537 = vperm.xlu0 %2441, %v287_v30   ;;  %v3005_v29 = vld [vmem:[%s2708_s13 + $0xb0] sm:$0xff]  ;;  %v3008_v30 = vld [vmem:[%s2708_s13 + $0xb8] sm:$0xff] }
  0x96   : > { %4438 = vst [vmem:[#allocation15_spill] sm:$0xff] %v3005_v29  ;;  %4439 = vst [vmem:[#allocation16_spill] sm:$0xff] %v3008_v30 }
  0x99   : > { %542 = vperm.xlu1 %2442, %v288_v31   ;;  %547 = vperm.xlu0 %2441, %v289_v32   ;;  %v300_v31 = vld [vmem:[%s4348_s2 + $0x50] sm:$0xff]  ;;  %v301_v32 = vld [vmem:[%s4348_s2 + $0x58] sm:$0xff] }
  0x9d   : > { %568 = vperm.xlu1 %2442, %v290_v33   ;;  %573 = vperm.xlu0 %2441, %v291_v34  }
  0xa1   : > { %680 = vperm.xlu1 %2442, %v306_v35   ;;  %685 = vperm.xlu0 %2441, %v307_v36  }
  0xa5   : > { %578 = vperm.xlu1 %2442, %v292_v37   ;;  %583 = vperm.xlu0 %2441, %v293_v38   ;;  %v316_v37 = vld [vmem:[%s4349_s3 + $0x50] sm:$0xff]  ;;  %v317_v38 = vld [vmem:[%s4349_s3 + $0x58] sm:$0xff] }
  0xa9   : > { %690 = vperm.xlu1 %2442, %v308_v39   ;;  %695 = vperm.xlu0 %2441, %v309_v40   ;;  %v3039_v39 = vld [vmem:[%s2708_s13 + $0xc0] sm:$0xff]  ;;  %v3042_v40 = vld [vmem:[%s2708_s13 + $0xc8] sm:$0xff] }
  0xaa   : > { %4440 = vst [vmem:[#allocation17_spill] sm:$0xff] %v3039_v39  ;;  %4441 = vst [vmem:[#allocation18_spill] sm:$0xff] %v3042_v40 }
  0xad   : > { %1056 = vrot.lane.b32.xlu1 %v2883_v41, %s2558_s16  ;;  %1058 = vrot.lane.b32.xlu0 %v2886_v42, %s2558_s16 }
  0xaf   : > { %v2898_v45 = vpop.permute.xlu1 %378  ;;  %v2900_v46 = vpop.permute.xlu0 %374 }
  0xb1   : > { %588 = vperm.xlu1 %2442, %v294_v43   ;;  %593 = vperm.xlu0 %2441, %v295_v44  }
  0xb3   : > { %v2902_v47 = vpop.permute.xlu1 %380  ;;  %v2904_v48 = vpop.permute.xlu0 %376 }
  0xb5   : > { %1104 = vrot.lane.b32.xlu1 %v2883_v41, %s2559_s8  ;;  %1106 = vrot.lane.b32.xlu0 %v2886_v42, %s2559_s8 }
  0xb7   : > { %v2916_v51 = vpop.permute.xlu1 %384  ;;  %v2918_v52 = vpop.permute.xlu0 %382 }
  0xb9   : > { %700 = vperm.xlu1 %2442, %v310_v49   ;;  %705 = vperm.xlu0 %2441, %v311_v50   ;;  %v302_v49 = vld [vmem:[%s4348_s2 + $0x60] sm:$0xff]  ;;  %v303_v50 = vld [vmem:[%s4348_s2 + $0x68] sm:$0xff] }
  0xbb   : > { %v2926_v55 = vpop.permute.xlu1 %388  ;;  %v2928_v56 = vpop.permute.xlu0 %386 }
  0xbd   : > { %1060 = vrot.lane.b32.xlu1 %v2921_v53, %s2558_s16  ;;  %1062 = vrot.lane.b32.xlu0 %v2924_v54, %s2558_s16 }
  0xbf   : > { %v2940_v59 = vpop.permute.xlu1 %392  ;;  %v2942_v60 = vpop.permute.xlu0 %390 }
  0xc1   : > { %598 = vperm.xlu1 %2442, %v296_v57   ;;  %603 = vperm.xlu0 %2441, %v297_v58  }
  0xc3   : > { %v2944_v61 = vpop.permute.xlu1 %396  ;;  %v2946_v62 = vpop.permute.xlu0 %394 }
  0xc4   : > { %4433 = vst [vmem:[#allocation10_spill] sm:$0xff] %v2946_v62 }
  0xc5   : > { %1108 = vrot.lane.b32.xlu1 %v2921_v53, %s2559_s8  ;;  %1110 = vrot.lane.b32.xlu0 %v2924_v54, %s2559_s8 }
  0xc7   : > { %v2958_v13 = vpop.permute.xlu1 %400  ;;  %v2960_v14 = vpop.permute.xlu0 %398 }
  0xc8   : > { %4434 = vst [vmem:[#allocation11_spill] sm:$0xff] %v2958_v13  ;;  %4435 = vst [vmem:[#allocation12_spill] sm:$0xff] %v2960_v14 }
  0xc9   : > { %710 = vperm.xlu1 %2442, %v312_v63   ;;  %715 = vperm.xlu0 %2441, %v313_v0   ;;  %v318_v63 = vld [vmem:[%s4349_s3 + $0x60] sm:$0xff]  ;;  %v319_v0 = vld [vmem:[%s4349_s3 + $0x68] sm:$0xff] }
  0xcb   : > { %v2968_v17 = vpop.permute.xlu1 %404  ;;  %v2970_v18 = vpop.permute.xlu0 %402 }
  0xcc   : > { %4436 = vst [vmem:[#allocation13_spill] sm:$0xff] %v2968_v17  ;;  %4437 = vst [vmem:[#allocation14_spill] sm:$0xff] %v2970_v18  ;;  %v3122_v18 = vld [vmem:[%s2708_s13 + $0xe8] sm:$0xff] }
  0xcd   : > { %1064 = vrot.lane.b32.xlu1 %v2963_v15, %s2558_s16  ;;  %1066 = vrot.lane.b32.xlu0 %v2966_v16, %s2558_s16  ;;  %4453 = vst [vmem:[#allocation30_spill] sm:$0xff] %v3122_v18 }
  0xcf   : > { %v2982_v21 = vpop.permute.xlu1 %424  ;;  %v2984_v22 = vpop.permute.xlu0 %422 }
  0xd1   : > { %608 = vperm.xlu1 %2442, %v298_v19   ;;  %613 = vperm.xlu0 %2441, %v299_v20  }
  0xd3   : > { %v2986_v23 = vpop.permute.xlu1 %428  ;;  %v2988_v24 = vpop.permute.xlu0 %426 }
  0xd5   : > { %1112 = vrot.lane.b32.xlu1 %v2963_v15, %s2559_s8  ;;  %1114 = vrot.lane.b32.xlu0 %v2966_v16, %s2559_s8 }
  0xd7   : > { %v3000_v27 = vpop.permute.xlu1 %432  ;;  %v3002_v28 = vpop.permute.xlu0 %430 }
  0xd9   : > { %720 = vperm.xlu1 %2442, %v314_v25   ;;  %725 = vperm.xlu0 %2441, %v315_v26   ;;  %v3077_v25 = vld [vmem:[%s2708_s13 + $0xd0] sm:$0xff]  ;;  %v3080_v26 = vld [vmem:[%s2708_s13 + $0xd8] sm:$0xff] }
  0xda   : > { %4448 = vst [vmem:[#allocation25_spill] sm:$0xff] %v3077_v25  ;;  %4449 = vst [vmem:[#allocation26_spill] sm:$0xff] %v3080_v26 }
  0xdb   : > { %v3020_v33 = vpop.permute.xlu1 %436  ;;  %v3022_v34 = vpop.permute.xlu0 %434 }
  0xdd   : > { %1068 = vrot.lane.b32.xlu1 %v3005_v29, %s2558_s16  ;;  %1070 = vrot.lane.b32.xlu0 %v3008_v30, %s2558_s16 }
  0xdf   : > { %v3028_v35 = vpop.permute.xlu1 %440  ;;  %v3030_v36 = vpop.permute.xlu0 %438 }
  0xe1   : > { %618 = vperm.xlu1 %2442, %v300_v31   ;;  %623 = vperm.xlu0 %2441, %v301_v32  }
  0xe3   : > { %v3044_v43 = vpop.permute.xlu1 %444  ;;  %v3046_v44 = vpop.permute.xlu0 %442 }
  0xe4   : > { %4442 = vst [vmem:[#allocation19_spill] sm:$0xff] %v3044_v43  ;;  %4443 = vst [vmem:[#allocation20_spill] sm:$0xff] %v3046_v44 }
  0xe5   : > { %1116 = vrot.lane.b32.xlu1 %v3005_v29, %s2559_s8  ;;  %1118 = vrot.lane.b32.xlu0 %v3008_v30, %s2559_s8 }
  0xe7   : > { %v3058_v57 = vpop.permute.xlu1 %448  ;;  %v3060_v58 = vpop.permute.xlu0 %446 }
  0xe8   : > { %4444 = vst [vmem:[#allocation21_spill] sm:$0xff] %v3058_v57  ;;  %4445 = vst [vmem:[#allocation22_spill] sm:$0xff] %v3060_v58 }
  0xe9   : > { %730 = vperm.xlu1 %2442, %v316_v37   ;;  %735 = vperm.xlu0 %2441, %v317_v38   ;;  %v304_v37 = vld [vmem:[%s4348_s2 + $0x70] sm:$0xff]  ;;  %v305_v38 = vld [vmem:[%s4348_s2 + $0x78] sm:$0xff] }
  0xeb   : > { %v3072_v19 = vpop.permute.xlu1 %452  ;;  %v3074_v20 = vpop.permute.xlu0 %450 }
  0xec   : > { %4446 = vst [vmem:[#allocation23_spill] sm:$0xff] %v3072_v19  ;;  %4447 = vst [vmem:[#allocation24_spill] sm:$0xff] %v3074_v20  ;;  %v320_v20 = vld [vmem:[%s4349_s3 + $0x70] sm:$0xff]  ;;  %v321_v19 = vld [vmem:[%s4349_s3 + $0x78] sm:$0xff] }
  0xed   : > { %1072 = vrot.lane.b32.xlu1 %v3039_v39, %s2558_s16  ;;  %1074 = vrot.lane.b32.xlu0 %v3042_v40, %s2558_s16 }
  0xf1   : > { %628 = vperm.xlu1 %2442, %v302_v49   ;;  %633 = vperm.xlu0 %2441, %v303_v50  }
  0xf5   : > { %1120 = vrot.lane.b32.xlu1 %v3039_v39, %s2559_s8  ;;  %1122 = vrot.lane.b32.xlu0 %v3042_v40, %s2559_s8  ;;  %v3144_v40 = vld [vmem:[%s2708_s13 + $0xf0] sm:$0xff]  ;;  %v3147_v39 = vld [vmem:[%s2708_s13 + $0xf8] sm:$0xff] }
  0xf6   : > { %4458 = vst [vmem:[#allocation35_spill] sm:$0xff] %v3144_v40  ;;  %4459 = vst [vmem:[#allocation36_spill] sm:$0xff] %v3147_v39 }
  0xf9   : > { %740 = vperm.xlu1 %2442, %v318_v63   ;;  %745 = vperm.xlu0 %2441, %v319_v0  }
  0xfc   : > { %v3082_v31 = vpop.permute.xlu1 %477  ;;  %v3084_v32 = vpop.permute.xlu0 %472 }
  0xfd   : > { %1076 = vrot.lane.b32.xlu1 %v3077_v25, %s2558_s16  ;;  %1078 = vrot.lane.b32.xlu0 %v3080_v26, %s2558_s16 }
 0x100   : > { %v3096_v49 = vpop.permute.xlu1 %482  ;;  %v3098_v50 = vpop.permute.xlu0 %487 }
 0x101   : > { %638 = vperm.xlu1 %2442, %v304_v37   ;;  %643 = vperm.xlu0 %2441, %v305_v38  }
 0x104   : > { %v3100_v63 = vpop.permute.xlu1 %492  ;;  %v3102_v0 = vpop.permute.xlu0 %497 }
 0x105   : > { %1124 = vrot.lane.b32.xlu1 %v3077_v25, %s2559_s8  ;;  %1126 = vrot.lane.b32.xlu0 %v3080_v26, %s2559_s8  ;;  %v3119_v25 = vld [vmem:[%s2708_s13 + $0xe0] sm:$0xff] }
 0x106   : > { %4452 = vst [vmem:[#allocation29_spill] sm:$0xff] %v3119_v25 }
 0x108   : > { %v3114_v37 = vpop.permute.xlu1 %502  ;;  %v3116_v38 = vpop.permute.xlu0 %507 }
 0x109   : > { %4450 = vst [vmem:[#allocation27_spill] sm:$0xff] %v3114_v37  ;;  %4451 = vst [vmem:[#allocation28_spill] sm:$0xff] %v3116_v38  ;;  %750 = vperm.xlu1 %2442, %v320_v20   ;;  %755 = vperm.xlu0 %2441, %v321_v19   ;;  %v2443_v19 = vld [vmem:[%s4350_s4] sm:$0xff]   ;;  %v354_v20 = vlaneseq }
 0x10a   : > { %2276 = vmatprep.mubr.bf16.mxu0 %v2443_v19  ;;  %2308 = vmatprep.mubr.bf16.mxu1 %v2443_v19  ;;  %v3169_v19 = vld [vmem:[%s2708_s13 + $0x100] sm:$0xff] }
 0x10c   : > { %v3124_v26 = vpop.permute.xlu1 %512  ;;  %v3126_v17 = vpop.permute.xlu0 %517 }
 0x10d   : > { %4454 = vst [vmem:[#allocation31_spill] sm:$0xff] %v3124_v26  ;;  %4455 = vst [vmem:[#allocation32_spill] sm:$0xff] %v3126_v17  ;;  %1080 = vrot.lane.b32.xlu1 %v3119_v25, %s2558_s16  ;;  %1082 = vrot.lane.b32.xlu0 %v3122_v18, %s2558_s16 }
 0x110   : > { %v3132_v58 = vpop.permute.xlu1 %522  ;;  %v3134_v57 = vpop.permute.xlu0 %527 }
 0x111   : > { %4456 = vst [vmem:[#allocation33_spill] sm:$0xff] %v3132_v58  ;;  %4457 = vst [vmem:[#allocation34_spill] sm:$0xff] %v3134_v57  ;;  %1128 = vrot.lane.b32.xlu1 %v3119_v25, %s2559_s8  ;;  %1130 = vrot.lane.b32.xlu0 %v3122_v18, %s2559_s8  ;;  %v3157_v18 = vand.u32 127, %v354_v20 }
 0x113   : > { %vm356_vm0 = vcmp.eq.s32.totalorder %v3157_v18, 0  ;;  %vm357_vm1 = vcmp.eq.s32.totalorder %v3157_v18, 127 }
 0x114   : > { %v3149_v14 = vpop.permute.xlu1 %532  ;;  %v3151_v13 = vpop.permute.xlu0 %537  ;;  %v455_v43 = vsel %vm357_vm1, 0.0, %v2982_v21  ;;  %v454_v11 = vsel %vm357_vm1, 0.0, %v2984_v22 }
 0x115   : > { %4460 = vst [vmem:[#allocation37_spill] sm:$0xff] %v3149_v14  ;;  %4461 = vst [vmem:[#allocation38_spill] sm:$0xff] %v3151_v13  ;;  %1084 = vrot.lane.b32.xlu1 %v3144_v40, %s2558_s16  ;;  %1086 = vrot.lane.b32.xlu0 %v3147_v39, %s2558_s16  ;;  %v3172_v13 = vld [vmem:[%s2708_s13 + $0x108] sm:$0xff] }
 0x118   : > { %v3159_v25 = vpop.permute.xlu1 %542  ;;  %v3161_v44 = vpop.permute.xlu0 %547 }
 0x119   : > { %4462 = vst [vmem:[#allocation39_spill] sm:$0xff] %v3159_v25  ;;  %4463 = vst [vmem:[#allocation40_spill] sm:$0xff] %v3161_v44  ;;  %1132 = vrot.lane.b32.xlu1 %v3144_v40, %s2559_s8  ;;  %1134 = vrot.lane.b32.xlu0 %v3147_v39, %s2559_s8  ;;  %v406_v44 = vsel %vm356_vm0, 0.0, %v2900_v46  ;;  %v407_v25 = vsel %vm356_vm0, 0.0, %v2904_v48 }
 0x11a   : > { %v550_v46 = vmul.f32 %v3084_v32, %v406_v44  ;;  %v551_v57 = vmul.f32 %v3082_v31, %v407_v25 }
 0x11c   : > { %v3174_v14 = vpop.permute.xlu1 %568  ;;  %v3176_v20 = vpop.permute.xlu0 %573 }
 0x11d   : > { %1371 = vrot.lane.b32.xlu1 %v3169_v19, %s2558_s16  ;;  %1373 = vrot.lane.b32.xlu0 %v3172_v13, %s2558_s16  ;;  %v646_v39 = vmul.f32 %v3174_v14, %v2718_v2  ;;  %v647_v40 = vmul.f32 %v3176_v20, %v2728_v4  ;;  %v3206_v4 = vld [vmem:[%s2708_s13 + $0x180] sm:$0xff] }
 0x11e   : > { %4464 = vst [vmem:[#allocation41_spill] sm:$0xff] %v3206_v4 }
 0x11f   : > { %v662_v48 = vadd.f32 %v646_v39, %v550_v46  ;;  %v663_v21 = vadd.f32 %v647_v40, %v551_v57  ;;  %v408_v39 = vsel %vm356_vm0, 0.0, %v2898_v45 }
 0x120   : > { %v3201_v2 = vpop.permute.xlu1 %680  ;;  %v3203_v58 = vpop.permute.xlu0 %685  ;;  %v552_v57 = vmul.f32 %v3096_v49, %v408_v39 }
 0x121   : > { %1686 = vrot.lane.b32.xlu1 %v3206_v4, %s2558_s16  ;;  %1688 = vrot.lane.b32.xlu0 %v3209_v12, %s2558_s16  ;;  %v758_v44 = vmul.f32 %v3201_v2, %v454_v11  ;;  %v759_v22 = vmul.f32 %v3203_v58, %v455_v43  ;;  %v409_v43 = vsel %vm356_vm0, 0.0, %v2902_v47 }
 0x122   : > { %v553_v45 = vmul.f32 %v3098_v50, %v409_v43 }
 0x123   : > { %v774_v25 = vadd.f32 %v758_v44, %v662_v48  ;;  %v775_v30 = vadd.f32 %v759_v22, %v663_v21 }
 0x124   : > { %v3217_v29 = vpop.permute.xlu1 %578  ;;  %v3219_v62 = vpop.permute.xlu0 %583 }
 0x125   : > { %v648_v46 = vmul.f32 %v3217_v29, %v2715_v1  ;;  %v649_v40 = vmul.f32 %v3219_v62, %v2725_v3  ;;  %1419 = vrot.lane.b32.xlu1 %v3169_v19, %s2559_s8  ;;  %1421 = vrot.lane.b32.xlu0 %v3172_v13, %s2559_s8  ;;  %v790_v11 = vpack.c.bf16 %v775_v30, %v774_v25  ;;  %v457_v1 = vsel %vm357_vm1, 0.0, %v2986_v23 }
 0x126   : > { %v456_v3 = vsel %vm357_vm1, 0.0, %v2988_v24 }
 0x127   : > { %2260 = vmatprep.subr.bf16.mxu0 %v790_v11  ;;  %v664_v47 = vadd.f32 %v648_v46, %v552_v57  ;;  %v665_v21 = vadd.f32 %v649_v40, %v553_v45  ;;  %v3257_v46 = vld [vmem:[%s2708_s13 + $0x118] sm:$0xff] }
 0x128   : > { %v3243_v30 = vpop.permute.xlu1 %690  ;;  %2261 = vmatpush3.bf16.msra.mxu0 %v790_v11  ;;  %v3245_v48 = vpop.permute.xlu0 %695  ;;  %v3254_v11 = vld [vmem:[%s2708_s13 + $0x110] sm:$0xff]  ;;  %4467 = vst [vmem:[#allocation44_spill] sm:$0xff] %v3257_v46 }
 0x129   : > { %1734 = vrot.lane.b32.xlu1 %v3206_v4, %s2559_s8  ;;  %1736 = vrot.lane.b32.xlu0 %v3209_v12, %s2559_s8  ;;  %v760_v23 = vmul.f32 %v3243_v30, %v456_v3  ;;  %v761_v44 = vmul.f32 %v3245_v48, %v457_v1  ;;  %4466 = vst [vmem:[#allocation43_spill] sm:$0xff] %v3254_v11  ;;  %v3272_v3 = vld [vmem:[%s2708_s13 + $0x190] sm:$0xff] }
 0x12b   : > { %v776_v22 = vadd.f32 %v760_v23, %v664_v47  ;;  %v777_v24 = vadd.f32 %v761_v44, %v665_v21  ;;  %v3275_v47 = vld [vmem:[%s2708_s13 + $0x198] sm:$0xff]  ;;  %v411_v44 = vsel %vm356_vm0, 0.0, %v2916_v51 }
 0x12c   : > { %v1057_v25 = vpop.permute.xlu1 %1056  ;;  %v1059_v39 = vpop.permute.xlu0 %1058 }
 0x12d   : > { %1375 = vrot.lane.b32.xlu1 %v3254_v11, %s2558_s16  ;;  %1377 = vrot.lane.b32.xlu0 %v3257_v46, %s2558_s16  ;;  %v791_v40 = vpack.c.bf16 %v777_v24, %v776_v22  ;;  %v1088_v43 = vsel %vm356_vm0, 0.0, %v1057_v25  ;;  %v1089_v57 = vsel %vm356_vm0, 0.0, %v1059_v39  ;;  %v410_v22 = vsel %vm356_vm0, 0.0, %v2918_v52 }
 0x12e   : > { %v1152_v21 = vmul.f32 %v1088_v43, %v3084_v32  ;;  %v1153_v23 = vmul.f32 %v1089_v57, %v3082_v31  ;;  %v1168_v24 = vmul.f32 %v2883_v41, %v3174_v14  ;;  %v1169_v25 = vmul.f32 %v2886_v42, %v3176_v20 }
 0x12f   : > { %2262 = vmatprep.subr.bf16.mxu0 %v791_v40  ;;  %v554_v57 = vmul.f32 %v3100_v63, %v410_v22 }
 0x130   : > { %v3267_v45 = vpop.permute.xlu1 %588  ;;  %2263 = vmatpush3.bf16.msra.mxu0 %v791_v40  ;;  %v3269_v1 = vpop.permute.xlu0 %593  ;;  %v1185_v41 = vadd.f32 %v1169_v25, %v1153_v23 }
 0x131   : > { %1690 = vrot.lane.b32.xlu1 %v3272_v3, %s2558_s16  ;;  %1692 = vrot.lane.b32.xlu0 %v3275_v47, %s2558_s16  ;;  %v650_v39 = vmul.f32 %v3267_v45, %v2738_v6  ;;  %v651_v51 = vmul.f32 %v3269_v1, %v2735_v5  ;;  %v1184_v6 = vadd.f32 %v1168_v24, %v1152_v21  ;;  %v459_v5 = vsel %vm357_vm1, 0.0, %v3000_v27 }
 0x133   : > { %v666_v23 = vadd.f32 %v650_v39, %v554_v57  ;;  %v3326_v39 = vld [vmem:[%s2708_s13 + $0x120] sm:$0xff]  ;;  %v3329_v57 = vld [vmem:[%s2708_s13 + $0x128] sm:$0xff] }
 0x134   : > { %v1105_v40 = vpop.permute.xlu1 %1104  ;;  %v1107_v43 = vpop.permute.xlu0 %1106 }
 0x135   : > { %v1136_v12 = vsel %vm357_vm1, 0.0, %v1105_v40  ;;  %v1137_v52 = vsel %vm357_vm1, 0.0, %v1107_v43  ;;  %1423 = vrot.lane.b32.xlu1 %v3254_v11, %s2559_s8  ;;  %1425 = vrot.lane.b32.xlu0 %v3257_v46, %s2559_s8  ;;  %v555_v40 = vmul.f32 %v3102_v0, %v411_v44  ;;  %v458_v43 = vsel %vm357_vm1, 0.0, %v3002_v28 }
 0x136   : > { %v1200_v42 = vmul.f32 %v1136_v12, %v3201_v2  ;;  %v1201_v22 = vmul.f32 %v1137_v52, %v3203_v58 }
 0x137   : > { %v667_v27 = vadd.f32 %v651_v51, %v555_v40  ;;  %v3344_v40 = vld [vmem:[%s2708_s13 + $0x1a0] sm:$0xff] }
 0x138   : > { %v3315_v11 = vpop.permute.xlu1 %700  ;;  %v3317_v46 = vpop.permute.xlu0 %705  ;;  %v1216_v21 = vadd.f32 %v1200_v42, %v1184_v6  ;;  %v1217_v12 = vadd.f32 %v1201_v22, %v1185_v41  ;;  %4472 = vst [vmem:[#allocation49_spill] sm:$0xff] %v3344_v40 }
 0x139   : > { %4468 = vst [vmem:[#allocation45_spill] sm:$0xff] %v3315_v11  ;;  %4469 = vst [vmem:[#allocation46_spill] sm:$0xff] %v3317_v46  ;;  %1738 = vrot.lane.b32.xlu1 %v3272_v3, %s2559_s8  ;;  %1740 = vrot.lane.b32.xlu0 %v3275_v47, %s2559_s8  ;;  %v762_v44 = vmul.f32 %v3315_v11, %v458_v43  ;;  %v763_v28 = vmul.f32 %v3317_v46, %v459_v5  ;;  %v3347_v43 = vld [vmem:[%s2708_s13 + $0x1a8] sm:$0xff] }
 0x13a   : > { %v1232_v24 = vpack.c.bf16 %v1217_v12, %v1216_v21  ;;  %4473 = vst [vmem:[#allocation50_spill] sm:$0xff] %v3347_v43  ;;  %v413_v12 = vsel %vm356_vm0, 0.0, %v2926_v55 }
 0x13b   : > { %v778_v25 = vadd.f32 %v762_v44, %v666_v23  ;;  %v779_v52 = vadd.f32 %v763_v28, %v667_v27  ;;  %v412_v23 = vsel %vm356_vm0, 0.0, %v2928_v56  ;;  %v1170_v27 = vmul.f32 %v2921_v53, %v3217_v29 }
 0x13c   : > { %v1061_v4 = vpop.permute.xlu1 %1060  ;;  %2292 = vmatprep.subr.bf16.mxu1 %v1232_v24  ;;  %v1063_v6 = vpop.permute.xlu0 %1062  ;;  %v1171_v44 = vmul.f32 %v2924_v54, %v3219_v62 }
 0x13d   : > { %1379 = vrot.lane.b32.xlu1 %v3326_v39, %s2558_s16  ;;  %1381 = vrot.lane.b32.xlu0 %v3329_v57, %s2558_s16  ;;  %v792_v51 = vpack.c.bf16 %v779_v52, %v778_v25  ;;  %v1090_v41 = vsel %vm356_vm0, 0.0, %v1061_v4  ;;  %v1091_v42 = vsel %vm356_vm0, 0.0, %v1063_v6  ;;  %v556_v52 = vmul.f32 %v3114_v37, %v412_v23 }
 0x13e   : > { %2293 = vmatpush3.bf16.msra.mxu1 %v1232_v24  ;;  %v1154_v4 = vmul.f32 %v1090_v41, %v3096_v49  ;;  %v1155_v21 = vmul.f32 %v1091_v42, %v3098_v50  ;;  %v557_v41 = vmul.f32 %v3116_v38, %v413_v12  ;;  %v460_v42 = vsel %vm357_vm1, 0.0, %v3022_v34 }
 0x13f   : > { %2264 = vmatprep.subr.bf16.mxu0 %v792_v51 }
 0x140   : > { %v3339_v22 = vpop.permute.xlu1 %598  ;;  %2265 = vmatpush3.bf16.msra.mxu0 %v792_v51  ;;  %v3341_v5 = vpop.permute.xlu0 %603  ;;  %v1187_v53 = vadd.f32 %v1171_v44, %v1155_v21 }
 0x141   : > { %4470 = vst [vmem:[#allocation47_spill] sm:$0xff] %v3339_v22  ;;  %4471 = vst [vmem:[#allocation48_spill] sm:$0xff] %v3341_v5  ;;  %1694 = vrot.lane.b32.xlu1 %v3344_v40, %s2558_s16  ;;  %1696 = vrot.lane.b32.xlu0 %v3347_v43, %s2558_s16  ;;  %v652_v28 = vmul.f32 %v3339_v22, %v2748_v8  ;;  %v653_v55 = vmul.f32 %v3341_v5, %v2745_v7  ;;  %v461_v7 = vsel %vm357_vm1, 0.0, %v3020_v33 }
 0x142   : > { %v1186_v8 = vadd.f32 %v1170_v27, %v1154_v4 }
 0x143   : > { %v668_v27 = vadd.f32 %v652_v28, %v556_v52  ;;  %v669_v33 = vadd.f32 %v653_v55, %v557_v41  ;;  %v3398_v28 = vld [vmem:[%s2708_s13 + $0x130] sm:$0xff]  ;;  %v3401_v52 = vld [vmem:[%s2708_s13 + $0x138] sm:$0xff] }
 0x144   : > { %v1109_v24 = vpop.permute.xlu1 %1108  ;;  %v1111_v25 = vpop.permute.xlu0 %1110  ;;  %4476 = vst [vmem:[#allocation53_spill] sm:$0xff] %v3398_v28  ;;  %4477 = vst [vmem:[#allocation54_spill] sm:$0xff] %v3401_v52  ;;  %v3416_v41 = vld [vmem:[%s2708_s13 + $0x1b0] sm:$0xff] }
 0x145   : > { %v1138_v6 = vsel %vm357_vm1, 0.0, %v1109_v24  ;;  %v1139_v56 = vsel %vm357_vm1, 0.0, %v1111_v25  ;;  %1427 = vrot.lane.b32.xlu1 %v3326_v39, %s2559_s8  ;;  %1429 = vrot.lane.b32.xlu0 %v3329_v57, %s2559_s8  ;;  %4480 = vst [vmem:[#allocation57_spill] sm:$0xff] %v3416_v41 }
 0x146   : > { %v1202_v54 = vmul.f32 %v1138_v6, %v3243_v30  ;;  %v1203_v51 = vmul.f32 %v1139_v56, %v3245_v48 }
 0x148   : > { %v1218_v23 = vadd.f32 %v1202_v54, %v1186_v8  ;;  %v1219_v24 = vadd.f32 %v1203_v51, %v1187_v53  ;;  %v3387_v4 = vpop.permute.xlu1 %710  ;;  %v3389_v21 = vpop.permute.xlu0 %715 }
 0x149   : > { %4474 = vst [vmem:[#allocation51_spill] sm:$0xff] %v3387_v4  ;;  %4475 = vst [vmem:[#allocation52_spill] sm:$0xff] %v3389_v21  ;;  %1742 = vrot.lane.b32.xlu1 %v3344_v40, %s2559_s8  ;;  %1744 = vrot.lane.b32.xlu0 %v3347_v43, %s2559_s8  ;;  %v764_v12 = vmul.f32 %v3387_v4, %v460_v42  ;;  %v765_v34 = vmul.f32 %v3389_v21, %v461_v7  ;;  %v3419_v42 = vld [vmem:[%s2708_s13 + $0x1b8] sm:$0xff]  ;;  %v4524_v40 = vld [vmem:[#allocation24_spill] sm:$0xff] }
 0x14a   : > { %v1233_v44 = vpack.c.bf16 %v1219_v24, %v1218_v23  ;;  %4481 = vst [vmem:[#allocation58_spill] sm:$0xff] %v3419_v42 }
 0x14b   : > { %v780_v25 = vadd.f32 %v764_v12, %v668_v27  ;;  %v781_v6 = vadd.f32 %v765_v34, %v669_v33  ;;  %v415_v27 = vsel %vm356_vm0, 0.0, %v2940_v59  ;;  %v414_v33 = vsel %vm356_vm0, 0.0, %v2942_v60 }
 0x14c   : > { %v1065_v56 = vpop.permute.xlu1 %1064  ;;  %2294 = vmatprep.subr.bf16.mxu1 %v1233_v44  ;;  %v1067_v8 = vpop.permute.xlu0 %1066  ;;  %v1172_v12 = vmul.f32 %v2963_v15, %v3267_v45  ;;  %v1173_v34 = vmul.f32 %v2966_v16, %v3269_v1 }
 0x14d   : > { %1383 = vrot.lane.b32.xlu1 %v3398_v28, %s2558_s16  ;;  %1385 = vrot.lane.b32.xlu0 %v3401_v52, %s2558_s16  ;;  %v793_v55 = vpack.c.bf16 %v781_v6, %v780_v25  ;;  %v1092_v53 = vsel %vm356_vm0, 0.0, %v1065_v56  ;;  %v1093_v54 = vsel %vm356_vm0, 0.0, %v1067_v8  ;;  %v558_v56 = vmul.f32 %v3124_v26, %v414_v33 }
 0x14e   : > { %2295 = vmatpush3.bf16.msra.mxu1 %v1233_v44  ;;  %v1156_v23 = vmul.f32 %v1092_v53, %v3100_v63  ;;  %v1157_v24 = vmul.f32 %v1093_v54, %v3102_v0  ;;  %v559_v53 = vmul.f32 %v3126_v17, %v415_v27  ;;  %v462_v54 = vsel %vm357_vm1, 0.0, %v3030_v36 }
 0x14f   : > { %2266 = vmatprep.subr.bf16.mxu0 %v793_v55 }
 0x150   : > { %v3411_v51 = vpop.permute.xlu1 %608  ;;  %2267 = vmatpush3.bf16.msra.mxu0 %v793_v55  ;;  %v3413_v7 = vpop.permute.xlu0 %613  ;;  %v1189_v15 = vadd.f32 %v1173_v34, %v1157_v24 }
 0x151   : > { %4478 = vst [vmem:[#allocation55_spill] sm:$0xff] %v3411_v51  ;;  %4479 = vst [vmem:[#allocation56_spill] sm:$0xff] %v3413_v7  ;;  %1698 = vrot.lane.b32.xlu1 %v3416_v41, %s2558_s16  ;;  %1700 = vrot.lane.b32.xlu0 %v3419_v42, %s2558_s16  ;;  %v654_v44 = vmul.f32 %v3411_v51, %v2758_v10  ;;  %v655_v59 = vmul.f32 %v3413_v7, %v2755_v9  ;;  %v463_v9 = vsel %vm357_vm1, 0.0, %v3028_v35 }
 0x152   : > { %v1188_v10 = vadd.f32 %v1172_v12, %v1156_v23 }
 0x153   : > { %v670_v12 = vadd.f32 %v654_v44, %v558_v56  ;;  %v671_v35 = vadd.f32 %v655_v59, %v559_v53  ;;  %v3470_v44 = vld [vmem:[%s2708_s13 + $0x140] sm:$0xff]  ;;  %v3473_v56 = vld [vmem:[%s2708_s13 + $0x148] sm:$0xff] }
 0x154   : > { %v1113_v25 = vpop.permute.xlu1 %1112  ;;  %v1115_v6 = vpop.permute.xlu0 %1114  ;;  %4484 = vst [vmem:[#allocation61_spill] sm:$0xff] %v3470_v44  ;;  %4485 = vst [vmem:[#allocation62_spill] sm:$0xff] %v3473_v56  ;;  %v3488_v53 = vld [vmem:[%s2708_s13 + $0x1c0] sm:$0xff] }
 0x155   : > { %v1140_v8 = vsel %vm357_vm1, 0.0, %v1113_v25  ;;  %v1141_v60 = vsel %vm357_vm1, 0.0, %v1115_v6  ;;  %1431 = vrot.lane.b32.xlu1 %v3398_v28, %s2559_s8  ;;  %1433 = vrot.lane.b32.xlu0 %v3401_v52, %s2559_s8  ;;  %4488 = vst [vmem:[#allocation65_spill] sm:$0xff] %v3488_v53 }
 0x156   : > { %v1204_v16 = vmul.f32 %v1140_v8, %v3315_v11  ;;  %v1205_v55 = vmul.f32 %v1141_v60, %v3317_v46 }
 0x158   : > { %v1220_v33 = vadd.f32 %v1204_v16, %v1188_v10  ;;  %v1221_v25 = vadd.f32 %v1205_v55, %v1189_v15  ;;  %v3459_v23 = vpop.permute.xlu1 %720  ;;  %v3461_v24 = vpop.permute.xlu0 %725 }
 0x159   : > { %4482 = vst [vmem:[#allocation59_spill] sm:$0xff] %v3459_v23  ;;  %4483 = vst [vmem:[#allocation60_spill] sm:$0xff] %v3461_v24  ;;  %1746 = vrot.lane.b32.xlu1 %v3416_v41, %s2559_s8  ;;  %1748 = vrot.lane.b32.xlu0 %v3419_v42, %s2559_s8  ;;  %v766_v27 = vmul.f32 %v3459_v23, %v462_v54  ;;  %v767_v36 = vmul.f32 %v3461_v24, %v463_v9  ;;  %v3491_v54 = vld [vmem:[%s2708_s13 + $0x1c8] sm:$0xff]  ;;  %v4495_v41 = vld [vmem:[#allocation8_spill] sm:$0xff] }
 0x15a   : > { %v1234_v34 = vpack.c.bf16 %v1221_v25, %v1220_v33  ;;  %4489 = vst [vmem:[#allocation66_spill] sm:$0xff] %v3491_v54 }
 0x15b   : > { %v782_v6 = vadd.f32 %v766_v27, %v670_v12  ;;  %v783_v8 = vadd.f32 %v767_v36, %v671_v35  ;;  %v417_v12 = vsel %vm356_vm0, 0.0, %v2944_v61  ;;  %v4490_v35 = vld [vmem:[#allocation10_spill] sm:$0xff]  ;;  %v4491_v36 = vld [vmem:[#allocation15_spill] sm:$0xff] }
 0x15c   : > { %v1069_v60 = vpop.permute.xlu1 %1068  ;;  %2296 = vmatprep.subr.bf16.mxu1 %v1234_v34  ;;  %v1071_v10 = vpop.permute.xlu0 %1070  ;;  %v416_v27 = vsel %vm356_vm0, 0.0, %v4490_v35 }
 0x15d   : > { %1387 = vrot.lane.b32.xlu1 %v3470_v44, %s2558_s16  ;;  %1389 = vrot.lane.b32.xlu0 %v3473_v56, %s2558_s16  ;;  %v794_v59 = vpack.c.bf16 %v783_v8, %v782_v6  ;;  %v1094_v15 = vsel %vm356_vm0, 0.0, %v1069_v60  ;;  %v1095_v16 = vsel %vm356_vm0, 0.0, %v1071_v10  ;;  %v4492_v6 = vld [vmem:[#allocation16_spill] sm:$0xff]  ;;  %v4493_v60 = vld [vmem:[#allocation9_spill] sm:$0xff] }
 0x15e   : > { %2297 = vmatpush3.bf16.msra.mxu1 %v1234_v34  ;;  %v1158_v33 = vmul.f32 %v1094_v15, %v3114_v37  ;;  %v1159_v25 = vmul.f32 %v1095_v16, %v3116_v38  ;;  %v1174_v34 = vmul.f32 %v4491_v36, %v3339_v22  ;;  %v1175_v8 = vmul.f32 %v4492_v6, %v3341_v5  ;;  %v4494_v16 = vld [vmem:[#allocation33_spill] sm:$0xff]  ;;  %v4496_v5 = vld [vmem:[#allocation19_spill] sm:$0xff]  ;;  %v4498_v22 = vld [vmem:[#allocation20_spill] sm:$0xff] }
 0x15f   : > { %2268 = vmatprep.subr.bf16.mxu0 %v794_v59  ;;  %v560_v42 = vmul.f32 %v4494_v16, %v416_v27  ;;  %v2454_v37 = vld [vmem:[%s2708_s13 + $0x78] sm:$0xff] }
 0x160   : > { %v3483_v55 = vpop.permute.xlu1 %618  ;;  %2269 = vmatpush3.bf16.msra.mxu0 %v794_v59  ;;  %v3485_v9 = vpop.permute.xlu0 %623  ;;  %v1190_v36 = vadd.f32 %v1174_v34, %v1158_v33  ;;  %v1191_v6 = vadd.f32 %v1175_v8, %v1159_v25 }
 0x161   : > { %4486 = vst [vmem:[#allocation63_spill] sm:$0xff] %v3483_v55  ;;  %4487 = vst [vmem:[#allocation64_spill] sm:$0xff] %v3485_v9  ;;  %1702 = vrot.lane.b32.xlu1 %v3488_v53, %s2558_s16  ;;  %1704 = vrot.lane.b32.xlu0 %v3491_v54, %s2558_s16  ;;  %v656_v10 = vmul.f32 %v3483_v55, %v4493_v60  ;;  %v657_v61 = vmul.f32 %v3485_v9, %v4495_v41  ;;  %v465_v41 = vsel %vm357_vm1, 0.0, %v4496_v5 }
 0x164   : > { %v1117_v59 = vpop.permute.xlu1 %1116  ;;  %v1119_v15 = vpop.permute.xlu0 %1118 }
 0x165   : > { %v1142_v52 = vsel %vm357_vm1, 0.0, %v1117_v59  ;;  %v1143_v35 = vsel %vm357_vm1, 0.0, %v1119_v15  ;;  %1435 = vrot.lane.b32.xlu1 %v3470_v44, %s2559_s8  ;;  %1437 = vrot.lane.b32.xlu0 %v3473_v56, %s2559_s8  ;;  %v4497_v59 = vld [vmem:[#allocation34_spill] sm:$0xff]  ;;  %v464_v15 = vsel %vm357_vm1, 0.0, %v4498_v22 }
 0x166   : > { %v1206_v60 = vmul.f32 %v1142_v52, %v3387_v4  ;;  %v1207_v27 = vmul.f32 %v1143_v35, %v3389_v21  ;;  %v561_v28 = vmul.f32 %v4497_v59, %v417_v12  ;;  %v672_v52 = vadd.f32 %v656_v10, %v560_v42  ;;  %v3542_v42 = vld [vmem:[%s2708_s13 + $0x150] sm:$0xff]  ;;  %v3545_v10 = vld [vmem:[%s2708_s13 + $0x158] sm:$0xff] }
 0x167   : > { %4499 = vst [vmem:[#allocation10_spill] sm:$0xff] %v3542_v42  ;;  %4500 = vst [vmem:[#allocation15_spill] sm:$0xff] %v3545_v10  ;;  %v4510_v21 = vld [vmem:[#allocation22_spill] sm:$0xff] }
 0x168   : > { %v1222_v44 = vadd.f32 %v1206_v60, %v1190_v36  ;;  %v1223_v38 = vadd.f32 %v1207_v27, %v1191_v6  ;;  %v3531_v33 = vpop.permute.xlu1 %730  ;;  %v3533_v25 = vpop.permute.xlu0 %735  ;;  %v673_v5 = vadd.f32 %v657_v61, %v561_v28  ;;  %v3560_v27 = vld [vmem:[%s2708_s13 + $0x1d0] sm:$0xff] }
 0x169   : > { %1750 = vrot.lane.b32.xlu1 %v3488_v53, %s2559_s8  ;;  %1752 = vrot.lane.b32.xlu0 %v3491_v54, %s2559_s8  ;;  %v768_v12 = vmul.f32 %v3531_v33, %v464_v15  ;;  %v769_v22 = vmul.f32 %v3533_v25, %v465_v41  ;;  %4501 = vst [vmem:[#allocation16_spill] sm:$0xff] %v3560_v27  ;;  %v3563_v41 = vld [vmem:[%s2708_s13 + $0x1d8] sm:$0xff] }
 0x16a   : > { %v1235_v34 = vpack.c.bf16 %v1223_v38, %v1222_v44  ;;  %4502 = vst [vmem:[#allocation9_spill] sm:$0xff] %v3563_v41 }
 0x16b   : > { %v784_v8 = vadd.f32 %v768_v12, %v672_v52  ;;  %v785_v35 = vadd.f32 %v769_v22, %v673_v5  ;;  %v4503_v5 = vld [vmem:[#allocation11_spill] sm:$0xff]  ;;  %v4504_v22 = vld [vmem:[#allocation12_spill] sm:$0xff] }
 0x16c   : > { %v1073_v36 = vpop.permute.xlu1 %1072  ;;  %2298 = vmatprep.subr.bf16.mxu1 %v1235_v34  ;;  %v1075_v6 = vpop.permute.xlu0 %1074  ;;  %v419_v12 = vsel %vm356_vm0, 0.0, %v4503_v5 }
 0x16d   : > { %1391 = vrot.lane.b32.xlu1 %v3542_v42, %s2558_s16  ;;  %1393 = vrot.lane.b32.xlu0 %v3545_v10, %s2558_s16  ;;  %v795_v28 = vpack.c.bf16 %v785_v35, %v784_v8  ;;  %v1096_v38 = vsel %vm356_vm0, 0.0, %v1073_v36  ;;  %v1097_v44 = vsel %vm356_vm0, 0.0, %v1075_v6  ;;  %v4505_v8 = vld [vmem:[#allocation17_spill] sm:$0xff]  ;;  %v4506_v36 = vld [vmem:[#allocation18_spill] sm:$0xff] }
 0x16e   : > { %2299 = vmatpush3.bf16.msra.mxu1 %v1235_v34  ;;  %v1160_v15 = vmul.f32 %v1096_v38, %v3124_v26  ;;  %v1161_v52 = vmul.f32 %v1097_v44, %v3126_v17  ;;  %v418_v34 = vsel %vm356_vm0, 0.0, %v4504_v22  ;;  %v1176_v35 = vmul.f32 %v4505_v8, %v3411_v51  ;;  %v4507_v44 = vld [vmem:[#allocation37_spill] sm:$0xff] }
 0x16f   : > { %2270 = vmatprep.subr.bf16.mxu0 %v795_v28  ;;  %v1177_v6 = vmul.f32 %v4506_v36, %v3413_v7  ;;  %v562_v56 = vmul.f32 %v4507_v44, %v418_v34  ;;  %v2452_v17 = vld [vmem:[%s2708_s13 + $0x68] sm:$0xff] }
 0x170   : > { %v3555_v61 = vpop.permute.xlu1 %628  ;;  %2271 = vmatpush3.bf16.msra.mxu0 %v795_v28  ;;  %v3557_v60 = vpop.permute.xlu0 %633  ;;  %v2451_v28 = vld [vmem:[%s2708_s13 + $0x60] sm:$0xff]  ;;  %v1192_v8 = vadd.f32 %v1176_v35, %v1160_v15  ;;  %v4508_v7 = vld [vmem:[#allocation21_spill] sm:$0xff] }
 0x171   : > { %1706 = vrot.lane.b32.xlu1 %v3560_v27, %s2558_s16  ;;  %1708 = vrot.lane.b32.xlu0 %v3563_v41, %s2558_s16  ;;  %v658_v54 = vmul.f32 %v2451_v28, %v3555_v61  ;;  %v659_v5 = vmul.f32 %v2452_v17, %v3557_v60  ;;  %v1193_v36 = vadd.f32 %v1177_v6, %v1161_v52  ;;  %v467_v17 = vsel %vm357_vm1, 0.0, %v4508_v7 }
 0x174   : > { %v1121_v38 = vpop.permute.xlu1 %1120  ;;  %v1123_v53 = vpop.permute.xlu0 %1122 }
 0x175   : > { %v1144_v26 = vsel %vm357_vm1, 0.0, %v1121_v38  ;;  %v1145_v22 = vsel %vm357_vm1, 0.0, %v1123_v53  ;;  %1439 = vrot.lane.b32.xlu1 %v3542_v42, %s2559_s8  ;;  %1441 = vrot.lane.b32.xlu0 %v3545_v10, %s2559_s8  ;;  %v4509_v38 = vld [vmem:[#allocation38_spill] sm:$0xff]  ;;  %v466_v53 = vsel %vm357_vm1, 0.0, %v4510_v21 }
 0x176   : > { %v1208_v28 = vmul.f32 %v1144_v26, %v3459_v23  ;;  %v1209_v34 = vmul.f32 %v1145_v22, %v3461_v24  ;;  %v563_v51 = vmul.f32 %v4509_v38, %v419_v12  ;;  %v674_v26 = vadd.f32 %v658_v54, %v562_v56  ;;  %v3614_v54 = vld [vmem:[%s2708_s13 + $0x160] sm:$0xff] }
 0x177   : > { %4511 = vst [vmem:[#allocation8_spill] sm:$0xff] %v3614_v54 }
 0x178   : > { %v1224_v42 = vadd.f32 %v1208_v28, %v1192_v8  ;;  %v1225_v4 = vadd.f32 %v1209_v34, %v1193_v36  ;;  %v3603_v15 = vpop.permute.xlu1 %740  ;;  %v3605_v52 = vpop.permute.xlu0 %745  ;;  %v675_v21 = vadd.f32 %v659_v5, %v563_v51  ;;  %v3617_v36 = vld [vmem:[%s2708_s13 + $0x168] sm:$0xff]  ;;  %v3628_v5 = vld [vmem:[%s2708_s13 + $0x170] sm:$0xff]  ;;  %v3631_v28 = vld [vmem:[%s2708_s13 + $0x178] sm:$0xff] }
 0x179   : > { %v770_v35 = vmul.f32 %v3603_v15, %v466_v53  ;;  %v771_v6 = vmul.f32 %v3605_v52, %v467_v17  ;;  %1754 = vrot.lane.b32.xlu1 %v3560_v27, %s2559_s8  ;;  %1756 = vrot.lane.b32.xlu0 %v3563_v41, %s2559_s8  ;;  %4512 = vst [vmem:[#allocation19_spill] sm:$0xff] %v3617_v36  ;;  %v3634_v34 = vld [vmem:[%s2708_s13 + $0x1f0] sm:$0xff]  ;;  %v4519_v41 = vld [vmem:[#allocation25_spill] sm:$0xff] }
 0x17a   : > { %v1236_v7 = vpack.c.bf16 %v1225_v4, %v1224_v42  ;;  %v1178_v27 = vmul.f32 %v4519_v41, %v3483_v55 }
 0x17b   : > { %v786_v12 = vadd.f32 %v770_v35, %v674_v26  ;;  %v787_v22 = vadd.f32 %v771_v6, %v675_v21  ;;  %v3641_v26 = vld [vmem:[%s2708_s13 + $0x1e0] sm:$0xff]  ;;  %v3644_v35 = vld [vmem:[%s2708_s13 + $0x1e8] sm:$0xff]  ;;  %v3647_v6 = vld [vmem:[%s2708_s13 + $0x1f8] sm:$0xff] }
 0x17c   : > { %v1077_v8 = vpop.permute.xlu1 %1076  ;;  %2300 = vmatprep.subr.bf16.mxu1 %v1236_v7  ;;  %v1079_v56 = vpop.permute.xlu0 %1078 }
 0x17d   : > { %1395 = vrot.lane.b32.xlu1 %v3614_v54, %s2558_s16  ;;  %1397 = vrot.lane.b32.xlu0 %v3617_v36, %s2558_s16  ;;  %v796_v4 = vpack.c.bf16 %v787_v22, %v786_v12  ;;  %v1098_v51 = vsel %vm356_vm0, 0.0, %v1077_v8  ;;  %v1099_v42 = vsel %vm356_vm0, 0.0, %v1079_v56  ;;  %v4516_v56 = vld [vmem:[#allocation13_spill] sm:$0xff] }
 0x17e   : > { %2301 = vmatpush3.bf16.msra.mxu1 %v1236_v7  ;;  %v1162_v21 = vmul.f32 %v1098_v51, %v4494_v16  ;;  %v1163_v7 = vmul.f32 %v1099_v42, %v4497_v59  ;;  %v4518_v42 = vld [vmem:[#allocation14_spill] sm:$0xff] }
 0x17f   : > { %2272 = vmatprep.subr.bf16.mxu0 %v796_v4  ;;  %v2453_v59 = vld [vmem:[%s2708_s13 + $0x70] sm:$0xff]  ;;  %s1985_s13 = scalar_lea.sflag [#allocation4], %s2702_s29 }
 0x180   : > { %v3636_v17 = vpop.permute.xlu1 %638  ;;  %2273 = vmatpush3.bf16.msra.mxu0 %v796_v4  ;;  %v3638_v53 = vpop.permute.xlu0 %643  ;;  %v421_v4 = vsel %vm356_vm0, 0.0, %v4516_v56  ;;  %v4521_v56 = vld [vmem:[#allocation39_spill] sm:$0xff] }
 0x181   : > { %1710 = vrot.lane.b32.xlu1 %v3641_v26, %s2558_s16  ;;  %1712 = vrot.lane.b32.xlu0 %v3644_v35, %s2558_s16  ;;  %v3657_v12 = vmul.f32 %v3628_v5, %v3636_v17  ;;  %v3661_v22 = vmul.f32 %v3631_v28, %v3638_v53  ;;  %v3665_v8 = vmul.f32 %v3634_v34, %v3636_v17 }
 0x182   : > { %v3672_v51 = vmul.f32 %v3647_v6, %v3638_v53 }
 0x183   : > { %4513 = vst [vmem:[#allocation20_spill] sm:$0xff] %v3657_v12  ;;  %4514 = vst [vmem:[#allocation11_spill] sm:$0xff] %v3661_v22  ;;  %v420_v12 = vsel %vm356_vm0, 0.0, %v4518_v42  ;;  %v4520_v22 = vld [vmem:[#allocation26_spill] sm:$0xff] }
 0x184   : > { %4515 = vst [vmem:[#allocation12_spill] sm:$0xff] %v3665_v8  ;;  %4517 = vst [vmem:[#allocation17_spill] sm:$0xff] %v3672_v51  ;;  %v1179_v10 = vmul.f32 %v4520_v22, %v3485_v9  ;;  %v660_v8 = vmul.f32 %v2453_v59, %v3636_v17  ;;  %v1125_v16 = vpop.permute.xlu1 %1124  ;;  %v1127_v24 = vpop.permute.xlu0 %1126  ;;  %v564_v23 = vmul.f32 %v4521_v56, %v420_v12  ;;  %v4522_v9 = vld [vmem:[#allocation23_spill] sm:$0xff] }
 0x185   : > { %v661_v51 = vmul.f32 %v2454_v37, %v3638_v53  ;;  %v1146_v43 = vsel %vm357_vm1, 0.0, %v1125_v16  ;;  %v1147_v42 = vsel %vm357_vm1, 0.0, %v1127_v24  ;;  %1443 = vrot.lane.b32.xlu1 %v3614_v54, %s2559_s8  ;;  %1445 = vrot.lane.b32.xlu0 %v3617_v36, %s2559_s8  ;;  %v1194_v59 = vadd.f32 %v1178_v27, %v1162_v21  ;;  %v4523_v16 = vld [vmem:[#allocation40_spill] sm:$0xff] }
 0x186   : > { %v1195_v41 = vadd.f32 %v1179_v10, %v1163_v7  ;;  %v1210_v22 = vmul.f32 %v1146_v43, %v3531_v33  ;;  %v1211_v12 = vmul.f32 %v1147_v42, %v3533_v25  ;;  %v469_v37 = vsel %vm357_vm1, 0.0, %v4522_v9  ;;  %v4525_v42 = vld [vmem:[#allocation29_spill] sm:$0xff] }
 0x187   : > { %v565_v55 = vmul.f32 %v4523_v16, %v421_v4  ;;  %v468_v24 = vsel %vm357_vm1, 0.0, %v4524_v40  ;;  %v676_v54 = vadd.f32 %v660_v8, %v564_v23 }
 0x188   : > { %v1226_v46 = vadd.f32 %v1210_v22, %v1194_v59  ;;  %v1227_v11 = vadd.f32 %v1211_v12, %v1195_v41  ;;  %v3703_v36 = vpop.permute.xlu1 %750  ;;  %v3705_v10 = vpop.permute.xlu0 %755  ;;  %v1180_v59 = vmul.f32 %v4525_v42, %v3555_v61  ;;  %v4526_v41 = vld [vmem:[#allocation30_spill] sm:$0xff] }
 0x189   : > { %v677_v43 = vadd.f32 %v661_v51, %v565_v55  ;;  %v772_v27 = vmul.f32 %v3703_v36, %v468_v24  ;;  %v773_v21 = vmul.f32 %v3705_v10, %v469_v37  ;;  %1758 = vrot.lane.b32.xlu1 %v3641_v26, %s2559_s8  ;;  %1760 = vrot.lane.b32.xlu0 %v3644_v35, %s2559_s8  ;;  %v3735_v24 = vld [vmem:[%s4350_s4 + $0x10] sm:$0xff]  }
 0x18a   : > { %v1237_v9 = vpack.c.bf16 %v1227_v11, %v1226_v46  ;;  %v1181_v22 = vmul.f32 %v4526_v41, %v3557_v60  ;;  %v3762_v41 = vld [vmem:[%s4350_s4 + $0x18] sm:$0xff]  }
 0x18b   : > { %v788_v40 = vadd.f32 %v772_v27, %v676_v54  ;;  %v789_v23 = vadd.f32 %v773_v21, %v677_v43  ;;  %v3726_v54 = vld [vmem:[%s4350_s4 + $0x8] sm:$0xff]  }
 0x18c   : > { %v1081_v7 = vpop.permute.xlu1 %1080  ;;  %2302 = vmatprep.subr.bf16.mxu1 %v1237_v9  ;;  %v1083_v8 = vpop.permute.xlu0 %1082 }
 0x18d   : > { %v1100_v4 = vsel %vm356_vm0, 0.0, %v1081_v7  ;;  %v1101_v55 = vsel %vm356_vm0, 0.0, %v1083_v8  ;;  %1399 = vrot.lane.b32.xlu1 %v3628_v5, %s2558_s16  ;;  %1401 = vrot.lane.b32.xlu0 %v3631_v28, %s2558_s16  ;;  %v797_v51 = vpack.c.bf16 %v789_v23, %v788_v40 }
 0x18e   : > { %v1164_v11 = vmul.f32 %v1100_v4, %v4507_v44  ;;  %v1165_v46 = vmul.f32 %v1101_v55, %v4509_v38  ;;  %2303 = vmatpush3.bf16.msra.mxu1 %v1237_v9 }
 0x18f   : > { %2274 = vmatprep.subr.bf16.mxu0 %v797_v51 }
 0x190   : > { %v1129_v12 = vpop.permute.xlu1 %1128  ;;  %2275 = vmatpush3.bf16.msra.mxu0 %v797_v51  ;;  %v1131_v37 = vpop.permute.xlu0 %1130  ;;  %v1196_v21 = vadd.f32 %v1180_v59, %v1164_v11  ;;  %v1197_v9 = vadd.f32 %v1181_v22, %v1165_v46  ;;  %v4527_v22 = vld [vmem:[#allocation35_spill] sm:$0xff] }
 0x191   : > { %v1148_v43 = vsel %vm357_vm1, 0.0, %v1129_v12  ;;  %v1149_v27 = vsel %vm357_vm1, 0.0, %v1131_v37  ;;  %1714 = vrot.lane.b32.xlu1 %v3634_v34, %s2558_s16  ;;  %1716 = vrot.lane.b32.xlu0 %v3647_v6, %s2558_s16  ;;  %v1182_v12 = vmul.f32 %v4527_v22, %v3636_v17  ;;  %v4528_v37 = vld [vmem:[#allocation36_spill] sm:$0xff]  ;;  %v3804_v22 = vld [vmem:[%s4350_s4 + $0x28] sm:$0xff]   ;;  %s2492_s16 = scalar_lea.vmem %s2491_s18, 16384 }
 0x192   : > { %v1212_v40 = vmul.f32 %v1148_v43, %v3603_v15  ;;  %v1213_v23 = vmul.f32 %v1149_v27, %v3605_v52  ;;  %v1183_v43 = vmul.f32 %v4528_v37, %v3638_v53  ;;  %p2494_p10 = scmp.lt.s32.totalorder %s2492_s16, %s2486_s28 }
 0x193   : > { %2277 = vmatmul.mubr.bf16.vlgmr.msra.gmra.mrb[0].mxu0 %v3726_v54 }
 0x194   : > { %v1228_v7 = vadd.f32 %v1212_v40, %v1196_v21  ;;  %v1229_v8 = vadd.f32 %v1213_v23, %v1197_v9  ;;  %v1085_v4 = vpop.permute.xlu1 %1084  ;;  %v1087_v55 = vpop.permute.xlu0 %1086  ;;  %2280 = vmatprep.mubr.bf16.mxu0 %v3735_v24  ;;  %p2495_p0 = por %p2494_p10, %p2493_p8 }
 0x195   : > { %v1102_v51 = vsel %vm356_vm0, 0.0, %v1085_v4  ;;  %v1103_v42 = vsel %vm356_vm0, 0.0, %v1087_v55  ;;  %1447 = vrot.lane.b32.xlu1 %v3628_v5, %s2559_s8  ;;  %1449 = vrot.lane.b32.xlu0 %v3631_v28, %s2559_s8  ;;  %v3771_v28 = vld [vmem:[%s4350_s4 + $0x20] sm:$0xff]  }
 0x196   : > { %v1166_v11 = vmul.f32 %v1102_v51, %v4521_v56  ;;  %v1167_v46 = vmul.f32 %v1103_v42, %v4523_v16  ;;  %v1238_v59 = vpack.c.bf16 %v1229_v8, %v1228_v7  ;;  %v338_v7 = vld [vmem:[%s4351_s5] sm:$0xff]  ;;  %v339_v8 = vld [vmem:[%s4351_s5 + $0x8] sm:$0xff]  ;;  %p2496_p2 = pnand %p2495_p0, %p2489_p13 }
 0x198   : > { %v1133_v5 = vpop.permute.xlu1 %1132  ;;  %2304 = vmatprep.subr.bf16.mxu1 %v1238_v59  ;;  %v1135_v27 = vpop.permute.xlu0 %1134  ;;  %v1198_v17 = vadd.f32 %v1182_v12, %v1166_v11  ;;  %v1199_v53 = vadd.f32 %v1183_v43, %v1167_v46  ;;  %v340_v46 = vld [vmem:[%s4351_s5 + $0x10] sm:$0xff] }
 0x199   : > { %v1150_v21 = vsel %vm357_vm1, 0.0, %v1133_v5  ;;  %v1151_v9 = vsel %vm357_vm1, 0.0, %v1135_v27  ;;  %1762 = vrot.lane.b32.xlu1 %v3634_v34, %s2559_s8  ;;  %1764 = vrot.lane.b32.xlu0 %v3647_v6, %s2559_s8  ;;  %v3810_v5 = vld [vmem:[%s4350_s4 + $0x30] sm:$0xff]  }
 0x19a   : > { %v1214_v40 = vmul.f32 %v1150_v21, %v3703_v36  ;;  %v1215_v23 = vmul.f32 %v1151_v9, %v3705_v10  ;;  %2305 = vmatpush3.bf16.msra.mxu1 %v1238_v59  ;;  %v341_v59 = vld [vmem:[%s4351_s5 + $0x18] sm:$0xff]  ;;  %v1483_v21 = vmul.f32 %v3169_v19, %v3174_v14  ;;  %v343_v19 = vld [vmem:[%s4351_s5 + $0x28] sm:$0xff] }
 0x19b   : > { %2281 = vmatmul.mubr.bf16.gmra.mrb[4].mxu0 %v3762_v41 }
 0x19c   : > { %v1230_v34 = vadd.f32 %v1214_v40, %v1198_v17  ;;  %v1231_v4 = vadd.f32 %v1215_v23, %v1199_v53  ;;  %v1372_v6 = vpop.permute.xlu1 %1371  ;;  %v1374_v55 = vpop.permute.xlu0 %1373  ;;  %2284 = vmatprep.mubr.bf16.mxu0 %v3771_v28  ;;  %v342_v17 = vld [vmem:[%s4351_s5 + $0x20] sm:$0xff]  ;;  %v1484_v53 = vmul.f32 %v3172_v13, %v3176_v20 }
 0x19d   : > { %v1403_v51 = vsel %vm356_vm0, 0.0, %v1372_v6  ;;  %800 = vperm.xlu1 %2442, %v338_v7   ;;  %805 = vperm.xlu0 %2441, %v339_v8   ;;  %v1404_v42 = vsel %vm356_vm0, 0.0, %v1374_v55 }
 0x19e   : > { %v1239_v11 = vpack.c.bf16 %v1231_v4, %v1230_v34  ;;  %v1467_v12 = vmul.f32 %v1403_v51, %v3084_v32  ;;  %v1468_v27 = vmul.f32 %v1404_v42, %v3082_v31 }
 0x1a0   : > { %v1687_v37 = vpop.permute.xlu1 %1686  ;;  %2306 = vmatprep.subr.bf16.mxu1 %v1239_v11  ;;  %v1689_v43 = vpop.permute.xlu0 %1688  ;;  %v1499_v23 = vadd.f32 %v1483_v21, %v1467_v12  ;;  %v1500_v34 = vadd.f32 %v1484_v53, %v1468_v27  ;;  %v4530_v12 = vld [vmem:[#allocation42_spill] sm:$0xff] }
 0x1a1   : > { %810 = vperm.xlu1 %2442, %v340_v46   ;;  %815 = vperm.xlu0 %2441, %v341_v59   ;;  %v1718_v9 = vsel %vm356_vm0, 0.0, %v1687_v37  ;;  %v1719_v40 = vsel %vm356_vm0, 0.0, %v1689_v43  ;;  %v345_v59 = vld [vmem:[%s4351_s5 + $0x38] sm:$0xff]  ;;  %v1799_v37 = vmul.f32 %v4530_v12, %v3176_v20  ;;  %v346_v20 = vld [vmem:[%s4351_s5 + $0x40] sm:$0xff] }
 0x1a2   : > { %2307 = vmatpush3.bf16.msra.mxu1 %v1239_v11  ;;  %v1782_v4 = vmul.f32 %v1718_v9, %v3084_v32  ;;  %v1783_v55 = vmul.f32 %v1719_v40, %v3082_v31  ;;  %v344_v32 = vld [vmem:[%s4351_s5 + $0x30] sm:$0xff]  ;;  %v4529_v11 = vld [vmem:[#allocation41_spill] sm:$0xff]  ;;  %v3850_v31 = vld [vmem:[%s4350_s4 + $0x38] sm:$0xff]  }
 0x1a3   : > { %2285 = vmatmul.mubr.bf16.gmra.mrb[8].mxu0 %v3804_v22  ;;  %v1798_v46 = vmul.f32 %v4529_v11, %v3174_v14 }
 0x1a4   : > { %v1420_v7 = vpop.permute.xlu1 %1419  ;;  %v1422_v8 = vpop.permute.xlu0 %1421  ;;  %2288 = vmatprep.mubr.bf16.mxu0 %v3810_v5  ;;  %v1815_v40 = vadd.f32 %v1799_v37, %v1783_v55  ;;  %v4531_v37 = vld [vmem:[#allocation43_spill] sm:$0xff] }
 0x1a5   : > { %v1451_v13 = vsel %vm357_vm1, 0.0, %v1420_v7  ;;  %2309 = vmatmul.mubr.bf16.vlgmr.msra.gmra.mrb[0].mxu1 %v3726_v54  ;;  %v1452_v6 = vsel %vm357_vm1, 0.0, %v1422_v8  ;;  %820 = vperm.xlu1 %2442, %v342_v17   ;;  %v1814_v17 = vadd.f32 %v1798_v46, %v1782_v4 }
 0x1a6   : > { %v1515_v51 = vmul.f32 %v1451_v13, %v3201_v2  ;;  %v1516_v42 = vmul.f32 %v1452_v6, %v3203_v58  ;;  %825 = vperm.xlu0 %2441, %v343_v19   ;;  %2312 = vmatprep.mubr.bf16.mxu1 %v3735_v24 }
 0x1a8   : > { %v1531_v43 = vadd.f32 %v1515_v51, %v1499_v23  ;;  %v1532_v27 = vadd.f32 %v1516_v42, %v1500_v34  ;;  %v1735_v21 = vpop.permute.xlu1 %1734  ;;  %v1737_v9 = vpop.permute.xlu0 %1736  ;;  %v347_v23 = vld [vmem:[%s4351_s5 + $0x48] sm:$0xff]  ;;  %v348_v42 = vld [vmem:[%s4351_s5 + $0x50] sm:$0xff] }
 0x1a9   : > { %v1766_v14 = vsel %vm357_vm1, 0.0, %v1735_v21  ;;  %v1767_v53 = vsel %vm357_vm1, 0.0, %v1737_v9  ;;  %830 = vperm.xlu1 %2442, %v344_v32   ;;  %v349_v32 = vld [vmem:[%s4351_s5 + $0x58] sm:$0xff]  ;;  %v350_v21 = vld [vmem:[%s4351_s5 + $0x60] sm:$0xff] }
 0x1aa   : > { %v1830_v19 = vmul.f32 %v1766_v14, %v3201_v2  ;;  %v1831_v7 = vmul.f32 %v1767_v53, %v3203_v58  ;;  %835 = vperm.xlu0 %2441, %v345_v59   ;;  %v1547_v8 = vpack.c.bf16 %v1532_v27, %v1531_v43  ;;  %v3870_v58 = vld [vmem:[%s4350_s4] sm:$0xff]   ;;  %v1485_v43 = vmul.f32 %v4531_v37, %v3217_v29  ;;  %v351_v53 = vld [vmem:[%s4351_s5 + $0x68] sm:$0xff] }
 0x1ab   : > { %2289 = vmatmul.mubr.bf16.gmra.mrb[12].mxu0 %v3850_v31  ;;  %v4532_v9 = vld [vmem:[#allocation44_spill] sm:$0xff] }
 0x1ac   : > { %v1846_v34 = vadd.f32 %v1830_v19, %v1814_v17  ;;  %v1847_v4 = vadd.f32 %v1831_v7, %v1815_v40  ;;  %v1376_v13 = vpop.permute.xlu1 %1375  ;;  %2324 = vmatprep.subr.bf16.mxu0 %v1547_v8  ;;  %v1378_v6 = vpop.permute.xlu0 %1377  ;;  %2340 = vmatprep.mubr.bf16.mxu0 %v3870_v58  ;;  %v1486_v17 = vmul.f32 %v4532_v9, %v3219_v62 }
 0x1ad   : > { %v1405_v2 = vsel %vm356_vm0, 0.0, %v1376_v13  ;;  %2313 = vmatmul.mubr.bf16.gmra.mrb[4].mxu1 %v3762_v41  ;;  %840 = vperm.xlu1 %2442, %v346_v20   ;;  %v1406_v55 = vsel %vm356_vm0, 0.0, %v1378_v6 }
 0x1ae   : > { %845 = vperm.xlu0 %2441, %v347_v23   ;;  %2325 = vmatpush3.bf16.msra.mxu0 %v1547_v8  ;;  %v1862_v51 = vpack.c.bf16 %v1847_v4, %v1846_v34  ;;  %v1469_v11 = vmul.f32 %v1405_v2, %v3096_v49  ;;  %v1470_v12 = vmul.f32 %v1406_v55, %v3098_v50  ;;  %v353_v55 = vld [vmem:[%s4351_s5 + $0x78] sm:$0xff] }
 0x1af   : > { %2316 = vmatprep.mubr.bf16.mxu1 %v3771_v28  ;;  %v1800_v2 = vmul.f32 %v3272_v3, %v3217_v29 }
 0x1b0   : > { %v1691_v46 = vpop.permute.xlu1 %1690  ;;  %2356 = vmatprep.subr.bf16.mxu1 %v1862_v51  ;;  %v1693_v59 = vpop.permute.xlu0 %1692  ;;  %v1501_v40 = vadd.f32 %v1485_v43, %v1469_v11  ;;  %v1502_v8 = vadd.f32 %v1486_v17, %v1470_v12 }
 0x1b1   : > { %850 = vperm.xlu1 %2442, %v348_v42   ;;  %2357 = vmatpush3.bf16.msra.mxu1 %v1862_v51  ;;  %v1720_v27 = vsel %vm356_vm0, 0.0, %v1691_v46  ;;  %v1721_v14 = vsel %vm356_vm0, 0.0, %v1693_v59 }
 0x1b2   : > { %855 = vperm.xlu0 %2441, %v349_v32   ;;  %v1784_v20 = vmul.f32 %v1720_v27, %v3096_v49  ;;  %v1785_v4 = vmul.f32 %v1721_v14, %v3098_v50  ;;  %v352_v49 = vld [vmem:[%s4351_s5 + $0x70] sm:$0xff]  ;;  %v1801_v50 = vmul.f32 %v3275_v47, %v3219_v62 }
 0x1b4   : > { %v1424_v19 = vpop.permute.xlu1 %1423  ;;  %v1426_v7 = vpop.permute.xlu0 %1425  ;;  %v1816_v46 = vadd.f32 %v1800_v2, %v1784_v20  ;;  %v1817_v29 = vadd.f32 %v1801_v50, %v1785_v4  ;;  %v4533_v2 = vld [vmem:[#allocation45_spill] sm:$0xff]  ;;  %v4534_v50 = vld [vmem:[#allocation46_spill] sm:$0xff] }
 0x1b5   : > { %v1453_v23 = vsel %vm357_vm1, 0.0, %v1424_v19  ;;  %2317 = vmatmul.mubr.bf16.gmra.mrb[8].mxu1 %v3804_v22  ;;  %v1454_v34 = vsel %vm357_vm1, 0.0, %v1426_v7  ;;  %860 = vperm.xlu1 %2442, %v350_v21   ;;  %v1487_v7 = vmul.f32 %v3326_v39, %v3267_v45 }
 0x1b6   : > { %v1517_v13 = vmul.f32 %v1453_v23, %v3243_v30  ;;  %v1518_v6 = vmul.f32 %v1454_v34, %v3245_v48  ;;  %865 = vperm.xlu0 %2441, %v351_v53   ;;  %2320 = vmatprep.mubr.bf16.mxu1 %v3810_v5 }
 0x1b8   : > { %v1533_v51 = vadd.f32 %v1517_v13, %v1501_v40  ;;  %v1534_v42 = vadd.f32 %v1518_v6, %v1502_v8  ;;  %v1739_v32 = vpop.permute.xlu1 %1738  ;;  %v1741_v11 = vpop.permute.xlu0 %1740  ;;  %v1488_v8 = vmul.f32 %v3329_v57, %v3269_v1  ;;  %v4535_v57 = vld [vmem:[#allocation49_spill] sm:$0xff] }
 0x1b9   : > { %v1768_v59 = vsel %vm357_vm1, 0.0, %v1739_v32  ;;  %v1769_v12 = vsel %vm357_vm1, 0.0, %v1741_v11  ;;  %870 = vperm.xlu1 %2442, %v352_v49   ;;  %v4536_v32 = vld [vmem:[#allocation50_spill] sm:$0xff] }
 0x1ba   : > { %v1832_v3 = vmul.f32 %v1768_v59, %v3243_v30  ;;  %v1833_v37 = vmul.f32 %v1769_v12, %v3245_v48  ;;  %875 = vperm.xlu0 %2441, %v353_v55   ;;  %v1548_v43 = vpack.c.bf16 %v1534_v42, %v1533_v51  ;;  %v1802_v42 = vmul.f32 %v4535_v57, %v3267_v45 }
 0x1bb   : > { %v1803_v11 = vmul.f32 %v4536_v32, %v3269_v1  ;;  %v4543_v32 = vld [vmem:[#allocation51_spill] sm:$0xff] }
 0x1bc   : > { %v1848_v62 = vadd.f32 %v1832_v3, %v1816_v46  ;;  %v1849_v47 = vadd.f32 %v1833_v37, %v1817_v29  ;;  %v1380_v27 = vpop.permute.xlu1 %1379  ;;  %2326 = vmatprep.subr.bf16.mxu0 %v1548_v43  ;;  %v1382_v21 = vpop.permute.xlu0 %1381 }
 0x1bd   : > { %2321 = vmatmul.mubr.bf16.gmra.mrb[12].mxu1 %v3850_v31  ;;  %2327 = vmatpush3.bf16.msra.mxu0 %v1548_v43  ;;  %v1407_v9 = vsel %vm356_vm0, 0.0, %v1380_v27  ;;  %v1408_v30 = vsel %vm356_vm0, 0.0, %v1382_v21 }
 0x1be   : > { %v1863_v17 = vpack.c.bf16 %v1849_v47, %v1848_v62  ;;  %2372 = vmatprep.mubr.bf16.mxu1 %v3870_v58  ;;  %v1471_v53 = vmul.f32 %v1407_v9, %v3100_v63  ;;  %v1472_v40 = vmul.f32 %v1408_v30, %v3102_v0 }
 0x1c0   : > { %v1695_v48 = vpop.permute.xlu1 %1694  ;;  %2358 = vmatprep.subr.bf16.mxu1 %v1863_v17  ;;  %v1697_v14 = vpop.permute.xlu0 %1696  ;;  %v1503_v34 = vadd.f32 %v1487_v7, %v1471_v53  ;;  %v1504_v49 = vadd.f32 %v1488_v8, %v1472_v40  ;;  %v4537_v53 = vld [vmem:[#allocation27_spill] sm:$0xff] }
 0x1c1   : > { %2359 = vmatpush3.bf16.msra.mxu1 %v1863_v17  ;;  %v1722_v19 = vsel %vm356_vm0, 0.0, %v1695_v48  ;;  %v1723_v58 = vsel %vm356_vm0, 0.0, %v1697_v14  ;;  %v4539_v8 = vld [vmem:[#allocation47_spill] sm:$0xff] }
 0x1c2   : > { %v1786_v4 = vmul.f32 %v1722_v19, %v3100_v63  ;;  %v1787_v39 = vmul.f32 %v1723_v58, %v3102_v0  ;;  %v4538_v19 = vld [vmem:[#allocation28_spill] sm:$0xff] }
 0x1c4   : > { %v1428_v20 = vpop.permute.xlu1 %1427  ;;  %v1430_v23 = vpop.permute.xlu0 %1429  ;;  %v1818_v29 = vadd.f32 %v1802_v42, %v1786_v4  ;;  %v1819_v37 = vadd.f32 %v1803_v11, %v1787_v39  ;;  %v4541_v4 = vld [vmem:[#allocation48_spill] sm:$0xff] }
 0x1c5   : > { %v1455_v13 = vsel %vm357_vm1, 0.0, %v1428_v20  ;;  %v1456_v6 = vsel %vm357_vm1, 0.0, %v1430_v23  ;;  %v4540_v20 = vld [vmem:[#allocation53_spill] sm:$0xff] }
 0x1c6   : > { %v1519_v55 = vmul.f32 %v1455_v13, %v4533_v2  ;;  %v1520_v51 = vmul.f32 %v1456_v6, %v4534_v50  ;;  %v1489_v23 = vmul.f32 %v4540_v20, %v4539_v8  ;;  %v4542_v13 = vld [vmem:[#allocation54_spill] sm:$0xff]  ;;  %v4547_v20 = vld [vmem:[#allocation31_spill] sm:$0xff] }
 0x1c7   : > { %v1490_v6 = vmul.f32 %v4542_v13, %v4541_v4 }
 0x1c8   : > { %v1535_v63 = vadd.f32 %v1519_v55, %v1503_v34  ;;  %v1536_v46 = vadd.f32 %v1520_v51, %v1504_v49  ;;  %v1743_v59 = vpop.permute.xlu1 %1742  ;;  %v1745_v12 = vpop.permute.xlu0 %1744 }
 0x1c9   : > { %v1770_v3 = vsel %vm357_vm1, 0.0, %v1743_v59  ;;  %v1771_v0 = vsel %vm357_vm1, 0.0, %v1745_v12  ;;  %v4545_v59 = vld [vmem:[#allocation57_spill] sm:$0xff] }
 0x1ca   : > { %v1834_v43 = vmul.f32 %v1770_v3, %v4533_v2  ;;  %v1835_v62 = vmul.f32 %v1771_v0, %v4534_v50  ;;  %v1549_v45 = vpack.c.bf16 %v1536_v46, %v1535_v63  ;;  %v4544_v63 = vld [vmem:[#allocation52_spill] sm:$0xff]  ;;  %v1804_v12 = vmul.f32 %v4545_v59, %v4539_v8 }
 0x1cc   : > { %v1850_v47 = vadd.f32 %v1834_v43, %v1818_v29  ;;  %v1851_v27 = vadd.f32 %v1835_v62, %v1819_v37  ;;  %v1384_v1 = vpop.permute.xlu1 %1383  ;;  %2328 = vmatprep.subr.bf16.mxu0 %v1549_v45  ;;  %v1386_v21 = vpop.permute.xlu0 %1385  ;;  %v4546_v29 = vld [vmem:[#allocation58_spill] sm:$0xff] }
 0x1cd   : > { %2329 = vmatpush3.bf16.msra.mxu0 %v1549_v45  ;;  %v1409_v9 = vsel %vm356_vm0, 0.0, %v1384_v1  ;;  %v1410_v30 = vsel %vm356_vm0, 0.0, %v1386_v21  ;;  %v1805_v3 = vmul.f32 %v4546_v29, %v4541_v4  ;;  %v4553_v29 = vld [vmem:[#allocation59_spill] sm:$0xff] }
 0x1ce   : > { %v1864_v17 = vpack.c.bf16 %v1851_v27, %v1850_v47  ;;  %v1473_v40 = vmul.f32 %v1409_v9, %v4537_v53  ;;  %v1474_v7 = vmul.f32 %v1410_v30, %v4538_v19 }
 0x1d0   : > { %v1699_v48 = vpop.permute.xlu1 %1698  ;;  %2360 = vmatprep.subr.bf16.mxu1 %v1864_v17  ;;  %v1701_v14 = vpop.permute.xlu0 %1700  ;;  %v1505_v2 = vadd.f32 %v1489_v23, %v1473_v40  ;;  %v1506_v57 = vadd.f32 %v1490_v6, %v1474_v7  ;;  %v4549_v6 = vld [vmem:[#allocation55_spill] sm:$0xff] }
 0x1d1   : > { %2361 = vmatpush3.bf16.msra.mxu1 %v1864_v17  ;;  %v1724_v58 = vsel %vm356_vm0, 0.0, %v1699_v48  ;;  %v1725_v34 = vsel %vm356_vm0, 0.0, %v1701_v14 }
 0x1d2   : > { %v1788_v55 = vmul.f32 %v1724_v58, %v4537_v53  ;;  %v1789_v42 = vmul.f32 %v1725_v34, %v4538_v19  ;;  %v4548_v34 = vld [vmem:[#allocation32_spill] sm:$0xff] }
 0x1d4   : > { %v1432_v49 = vpop.permute.xlu1 %1431  ;;  %v1434_v39 = vpop.permute.xlu0 %1433  ;;  %v1820_v45 = vadd.f32 %v1804_v12, %v1788_v55  ;;  %v1821_v1 = vadd.f32 %v1805_v3, %v1789_v42  ;;  %v4551_v55 = vld [vmem:[#allocation56_spill] sm:$0xff] }
 0x1d5   : > { %v1457_v50 = vsel %vm357_vm1, 0.0, %v1432_v49  ;;  %v1458_v51 = vsel %vm357_vm1, 0.0, %v1434_v39  ;;  %v4550_v49 = vld [vmem:[#allocation61_spill] sm:$0xff] }
 0x1d6   : > { %v1521_v11 = vmul.f32 %v1457_v50, %v4543_v32  ;;  %v1522_v46 = vmul.f32 %v1458_v51, %v4544_v63  ;;  %v1491_v39 = vmul.f32 %v4550_v49, %v4549_v6  ;;  %v4552_v50 = vld [vmem:[#allocation62_spill] sm:$0xff]  ;;  %v4557_v49 = vld [vmem:[#allocation33_spill] sm:$0xff] }
 0x1d7   : > { %v1492_v51 = vmul.f32 %v4552_v50, %v4551_v55 }
 0x1d8   : > { %v1537_v0 = vadd.f32 %v1521_v11, %v1505_v2  ;;  %v1538_v37 = vadd.f32 %v1522_v46, %v1506_v57  ;;  %v1747_v43 = vpop.permute.xlu1 %1746  ;;  %v1749_v62 = vpop.permute.xlu0 %1748 }
 0x1d9   : > { %v1772_v47 = vsel %vm357_vm1, 0.0, %v1747_v43  ;;  %v1773_v27 = vsel %vm357_vm1, 0.0, %v1749_v62  ;;  %v4555_v43 = vld [vmem:[#allocation65_spill] sm:$0xff] }
 0x1da   : > { %v1836_v21 = vmul.f32 %v1772_v47, %v4543_v32  ;;  %v1837_v9 = vmul.f32 %v1773_v27, %v4544_v63  ;;  %v1550_v17 = vpack.c.bf16 %v1538_v37, %v1537_v0  ;;  %v4554_v0 = vld [vmem:[#allocation60_spill] sm:$0xff]  ;;  %v1806_v62 = vmul.f32 %v4555_v43, %v4549_v6 }
 0x1dc   : > { %v1852_v30 = vadd.f32 %v1836_v21, %v1820_v45  ;;  %v1853_v48 = vadd.f32 %v1837_v9, %v1821_v1  ;;  %v1388_v14 = vpop.permute.xlu1 %1387  ;;  %2330 = vmatprep.subr.bf16.mxu0 %v1550_v17  ;;  %v1390_v53 = vpop.permute.xlu0 %1389  ;;  %v4556_v45 = vld [vmem:[#allocation66_spill] sm:$0xff] }
 0x1dd   : > { %2331 = vmatpush3.bf16.msra.mxu0 %v1550_v17  ;;  %v1411_v40 = vsel %vm356_vm0, 0.0, %v1388_v14  ;;  %v1412_v7 = vsel %vm356_vm0, 0.0, %v1390_v53  ;;  %v1807_v47 = vmul.f32 %v4556_v45, %v4551_v55 }
 0x1de   : > { %v1865_v19 = vpack.c.bf16 %v1853_v48, %v1852_v30  ;;  %v1475_v23 = vmul.f32 %v1411_v40, %v4547_v20  ;;  %v1476_v4 = vmul.f32 %v1412_v7, %v4548_v34 }
 0x1e0   : > { %v1703_v58 = vpop.permute.xlu1 %1702  ;;  %2362 = vmatprep.subr.bf16.mxu1 %v1865_v19  ;;  %v1705_v8 = vpop.permute.xlu0 %1704  ;;  %v1507_v32 = vadd.f32 %v1491_v39, %v1475_v23  ;;  %v1508_v59 = vadd.f32 %v1492_v51, %v1476_v4  ;;  %v4559_v51 = vld [vmem:[#allocation63_spill] sm:$0xff] }
 0x1e1   : > { %2363 = vmatpush3.bf16.msra.mxu1 %v1865_v19  ;;  %v1726_v13 = vsel %vm356_vm0, 0.0, %v1703_v58  ;;  %v1727_v2 = vsel %vm356_vm0, 0.0, %v1705_v8 }
 0x1e2   : > { %v1790_v11 = vmul.f32 %v1726_v13, %v4547_v20  ;;  %v1791_v12 = vmul.f32 %v1727_v2, %v4548_v34  ;;  %v4558_v2 = vld [vmem:[#allocation34_spill] sm:$0xff] }
 0x1e4   : > { %v1436_v57 = vpop.permute.xlu1 %1435  ;;  %v1438_v42 = vpop.permute.xlu0 %1437  ;;  %v1822_v17 = vadd.f32 %v1806_v62, %v1790_v11  ;;  %v1823_v14 = vadd.f32 %v1807_v47, %v1791_v12  ;;  %v4561_v11 = vld [vmem:[#allocation64_spill] sm:$0xff] }
 0x1e5   : > { %v1459_v63 = vsel %vm357_vm1, 0.0, %v1436_v57  ;;  %v1460_v46 = vsel %vm357_vm1, 0.0, %v1438_v42  ;;  %v4560_v57 = vld [vmem:[#allocation10_spill] sm:$0xff] }
 0x1e6   : > { %v1523_v3 = vmul.f32 %v1459_v63, %v4553_v29  ;;  %v1524_v37 = vmul.f32 %v1460_v46, %v4554_v0  ;;  %v1493_v42 = vmul.f32 %v4560_v57, %v4559_v51  ;;  %v4562_v63 = vld [vmem:[#allocation15_spill] sm:$0xff] }
 0x1e7   : > { %v1494_v46 = vmul.f32 %v4562_v63, %v4561_v11 }
 0x1e8   : > { %v1539_v27 = vadd.f32 %v1523_v3, %v1507_v32  ;;  %v1540_v1 = vadd.f32 %v1524_v37, %v1508_v59  ;;  %v1751_v21 = vpop.permute.xlu1 %1750  ;;  %v1753_v9 = vpop.permute.xlu0 %1752 }
 0x1e9   : > { %v1774_v30 = vsel %vm357_vm1, 0.0, %v1751_v21  ;;  %v1775_v48 = vsel %vm357_vm1, 0.0, %v1753_v9  ;;  %v4564_v21 = vld [vmem:[#allocation9_spill] sm:$0xff] }
 0x1ea   : > { %v1838_v53 = vmul.f32 %v1774_v30, %v4553_v29  ;;  %v1839_v40 = vmul.f32 %v1775_v48, %v4554_v0  ;;  %v1551_v19 = vpack.c.bf16 %v1540_v1, %v1539_v27  ;;  %v4563_v27 = vld [vmem:[#allocation16_spill] sm:$0xff]  ;;  %v1809_v9 = vmul.f32 %v4564_v21, %v4561_v11 }
 0x1eb   : > { %v1808_v1 = vmul.f32 %v4563_v27, %v4559_v51  ;;  %v4565_v51 = vld [vmem:[#allocation8_spill] sm:$0xff] }
 0x1ec   : > { %v1854_v7 = vadd.f32 %v1838_v53, %v1822_v17  ;;  %v1855_v58 = vadd.f32 %v1839_v40, %v1823_v14  ;;  %v1392_v8 = vpop.permute.xlu1 %1391  ;;  %2332 = vmatprep.subr.bf16.mxu0 %v1551_v19  ;;  %v1394_v20 = vpop.permute.xlu0 %1393  ;;  %v1495_v57 = vmul.f32 %v4565_v51, %v3555_v61 }
 0x1ed   : > { %2333 = vmatpush3.bf16.msra.mxu0 %v1551_v19  ;;  %v1413_v23 = vsel %vm356_vm0, 0.0, %v1392_v8  ;;  %v1414_v4 = vsel %vm356_vm0, 0.0, %v1394_v20 }
 0x1ee   : > { %v1866_v34 = vpack.c.bf16 %v1855_v58, %v1854_v7  ;;  %v1477_v39 = vmul.f32 %v1413_v23, %v4557_v49  ;;  %v1478_v55 = vmul.f32 %v1414_v4, %v4558_v2 }
 0x1f0   : > { %v1707_v13 = vpop.permute.xlu1 %1706  ;;  %2364 = vmatprep.subr.bf16.mxu1 %v1866_v34  ;;  %v1709_v6 = vpop.permute.xlu0 %1708  ;;  %v1509_v29 = vadd.f32 %v1493_v42, %v1477_v39  ;;  %v1510_v43 = vadd.f32 %v1494_v46, %v1478_v55 }
 0x1f1   : > { %2365 = vmatpush3.bf16.msra.mxu1 %v1866_v34  ;;  %v1728_v50 = vsel %vm356_vm0, 0.0, %v1707_v13  ;;  %v1729_v32 = vsel %vm356_vm0, 0.0, %v1709_v6 }
 0x1f2   : > { %v1792_v3 = vmul.f32 %v1728_v50, %v4557_v49  ;;  %v1793_v62 = vmul.f32 %v1729_v32, %v4558_v2  ;;  %v4566_v32 = vld [vmem:[#allocation19_spill] sm:$0xff] }
 0x1f3   : > { %v1496_v11 = vmul.f32 %v4566_v32, %v3557_v60 }
 0x1f4   : > { %v1440_v59 = vpop.permute.xlu1 %1439  ;;  %v1442_v12 = vpop.permute.xlu0 %1441  ;;  %v1824_v53 = vadd.f32 %v1808_v1, %v1792_v3  ;;  %v1825_v7 = vadd.f32 %v1809_v9, %v1793_v62 }
 0x1f5   : > { %v1461_v0 = vsel %vm357_vm1, 0.0, %v1440_v59  ;;  %v1462_v37 = vsel %vm357_vm1, 0.0, %v1442_v12 }
 0x1f6   : > { %v1525_v45 = vmul.f32 %v1461_v0, %v3531_v33  ;;  %v1526_v47 = vmul.f32 %v1462_v37, %v3533_v25 }
 0x1f8   : > { %v1541_v17 = vadd.f32 %v1525_v45, %v1509_v29  ;;  %v1542_v30 = vadd.f32 %v1526_v47, %v1510_v43  ;;  %v1755_v48 = vpop.permute.xlu1 %1754  ;;  %v1757_v14 = vpop.permute.xlu0 %1756  ;;  %v1810_v45 = vmul.f32 %v3641_v26, %v3555_v61  ;;  %v1811_v47 = vmul.f32 %v3644_v35, %v3557_v60 }
 0x1f9   : > { %v1776_v40 = vsel %vm357_vm1, 0.0, %v1755_v48  ;;  %v1777_v19 = vsel %vm357_vm1, 0.0, %v1757_v14 }
 0x1fa   : > { %v1840_v58 = vmul.f32 %v1776_v40, %v3531_v33  ;;  %v1841_v8 = vmul.f32 %v1777_v19, %v3533_v25  ;;  %v1552_v20 = vpack.c.bf16 %v1542_v30, %v1541_v17 }
 0x1fc   : > { %v1856_v23 = vadd.f32 %v1840_v58, %v1824_v53  ;;  %v1857_v34 = vadd.f32 %v1841_v8, %v1825_v7  ;;  %v1396_v4 = vpop.permute.xlu1 %1395  ;;  %2334 = vmatprep.subr.bf16.mxu0 %v1552_v20  ;;  %v1398_v13 = vpop.permute.xlu0 %1397 }
 0x1fd   : > { %2335 = vmatpush3.bf16.msra.mxu0 %v1552_v20  ;;  %v1415_v6 = vsel %vm356_vm0, 0.0, %v1396_v4  ;;  %v1416_v39 = vsel %vm356_vm0, 0.0, %v1398_v13  ;;  %v4567_v13 = vld [vmem:[#allocation20_spill] sm:$0xff] }
 0x1fe   : > { %v1867_v49 = vpack.c.bf16 %v1857_v34, %v1856_v23  ;;  %v1479_v33 = vmul.f32 %v1415_v6, %v4507_v44  ;;  %v1480_v25 = vmul.f32 %v1416_v39, %v4509_v38 }
 0x200   : > { %v1711_v2 = vpop.permute.xlu1 %1710  ;;  %2366 = vmatprep.subr.bf16.mxu1 %v1867_v49  ;;  %v1713_v55 = vpop.permute.xlu0 %1712  ;;  %v1511_v59 = vadd.f32 %v1495_v57, %v1479_v33  ;;  %v1512_v0 = vadd.f32 %v1496_v11, %v1480_v25 }
 0x201   : > { %2367 = vmatpush3.bf16.msra.mxu1 %v1867_v49  ;;  %v1730_v50 = vsel %vm356_vm0, 0.0, %v1711_v2  ;;  %v1731_v42 = vsel %vm356_vm0, 0.0, %v1713_v55  ;;  %v4568_v55 = vld [vmem:[#allocation11_spill] sm:$0xff] }
 0x202   : > { %v1794_v12 = vmul.f32 %v1730_v50, %v4507_v44  ;;  %v1795_v37 = vmul.f32 %v1731_v42, %v4509_v38 }
 0x204   : > { %v1444_v63 = vpop.permute.xlu1 %1443  ;;  %v1446_v46 = vpop.permute.xlu0 %1445  ;;  %v1826_v9 = vadd.f32 %v1810_v45, %v1794_v12  ;;  %v1827_v30 = vadd.f32 %v1811_v47, %v1795_v37  ;;  %v4570_v12 = vld [vmem:[#allocation17_spill] sm:$0xff] }
 0x205   : > { %v1463_v29 = vsel %vm357_vm1, 0.0, %v1444_v63  ;;  %v1464_v3 = vsel %vm357_vm1, 0.0, %v1446_v46  ;;  %v4569_v63 = vld [vmem:[#allocation12_spill] sm:$0xff] }
 0x206   : > { %v1527_v43 = vmul.f32 %v1463_v29, %v3603_v15  ;;  %v1528_v62 = vmul.f32 %v1464_v3, %v3605_v52 }
 0x208   : > { %v1543_v44 = vadd.f32 %v1527_v43, %v1511_v59  ;;  %v1544_v27 = vadd.f32 %v1528_v62, %v1512_v0  ;;  %v1759_v1 = vpop.permute.xlu1 %1758  ;;  %v1761_v21 = vpop.permute.xlu0 %1760 }
 0x209   : > { %v1778_v17 = vsel %vm357_vm1, 0.0, %v1759_v1  ;;  %v1779_v38 = vsel %vm357_vm1, 0.0, %v1761_v21 }
 0x20a   : > { %v1842_v48 = vmul.f32 %v1778_v17, %v3603_v15  ;;  %v1843_v14 = vmul.f32 %v1779_v38, %v3605_v52  ;;  %v1553_v61 = vpack.c.bf16 %v1544_v27, %v1543_v44 }
 0x20c   : > { %v1858_v26 = vadd.f32 %v1842_v48, %v1826_v9  ;;  %v1859_v53 = vadd.f32 %v1843_v14, %v1827_v30  ;;  %v1400_v60 = vpop.permute.xlu1 %1399  ;;  %2336 = vmatprep.subr.bf16.mxu0 %v1553_v61  ;;  %v1402_v35 = vpop.permute.xlu0 %1401 }
 0x20d   : > { %2337 = vmatpush3.bf16.msra.mxu0 %v1553_v61  ;;  %v1417_v40 = vsel %vm356_vm0, 0.0, %v1400_v60  ;;  %v1418_v7 = vsel %vm356_vm0, 0.0, %v1402_v35 }
 0x20e   : > { %v1868_v19 = vpack.c.bf16 %v1859_v53, %v1858_v26  ;;  %v1481_v15 = vmul.f32 %v1417_v40, %v4521_v56  ;;  %v1482_v52 = vmul.f32 %v1418_v7, %v4523_v16 }
 0x210   : > { %v1715_v58 = vpop.permute.xlu1 %1714  ;;  %2368 = vmatprep.subr.bf16.mxu1 %v1868_v19  ;;  %v1717_v8 = vpop.permute.xlu0 %1716  ;;  %v1513_v6 = vadd.f32 %v4567_v13, %v1481_v15  ;;  %v1514_v33 = vadd.f32 %v4568_v55, %v1482_v52 }
 0x211   : > { %2369 = vmatpush3.bf16.msra.mxu1 %v1868_v19  ;;  %v1732_v20 = vsel %vm356_vm0, 0.0, %v1715_v58  ;;  %v1733_v23 = vsel %vm356_vm0, 0.0, %v1717_v8 }
 0x212   : > { %v1796_v49 = vmul.f32 %v1732_v20, %v4521_v56  ;;  %v1797_v25 = vmul.f32 %v1733_v23, %v4523_v16 }
 0x214   : > { %v1448_v34 = vpop.permute.xlu1 %1447  ;;  %v1450_v4 = vpop.permute.xlu0 %1449  ;;  %v1828_v56 = vadd.f32 %v4569_v63, %v1796_v49  ;;  %v1829_v29 = vadd.f32 %v4570_v12, %v1797_v25 }
 0x215   : > { %v1465_v39 = vsel %vm357_vm1, 0.0, %v1448_v34  ;;  %v1466_v2 = vsel %vm357_vm1, 0.0, %v1450_v4 }
 0x216   : > { %v1529_v50 = vmul.f32 %v1465_v39, %v3703_v36  ;;  %v1530_v51 = vmul.f32 %v1466_v2, %v3705_v10 }
 0x218   : > { %v1545_v57 = vadd.f32 %v1529_v50, %v1513_v6  ;;  %v1546_v42 = vadd.f32 %v1530_v51, %v1514_v33  ;;  %v1763_v32 = vpop.permute.xlu1 %1762  ;;  %v1765_v11 = vpop.permute.xlu0 %1764 }
 0x219   : > { %v1780_v46 = vsel %vm357_vm1, 0.0, %v1763_v32  ;;  %v1781_v59 = vsel %vm357_vm1, 0.0, %v1765_v11 }
 0x21a   : > { %v1844_v16 = vmul.f32 %v1780_v46, %v3703_v36  ;;  %v1845_v3 = vmul.f32 %v1781_v59, %v3705_v10  ;;  %v1554_v0 = vpack.c.bf16 %v1546_v42, %v1545_v57 }
 0x21c   : > { %v1860_v37 = vadd.f32 %v1844_v16, %v1828_v56  ;;  %v1861_v43 = vadd.f32 %v1845_v3, %v1829_v29  ;;  %2338 = vmatprep.subr.bf16.mxu0 %v1554_v0  ;;  %v4131_v18 = vpop.permute.xlu1 %800  ;;  %v4133_v36 = vpop.permute.xlu0 %805 }
 0x21d   : > { %2339 = vmatpush3.bf16.msra.mxu0 %v1554_v0 }
 0x21e   : > { %v1869_v62 = vpack.c.bf16 %v1861_v43, %v1860_v37 }
 0x220   : > { %2341 = vmatmul.mubr.bf16.vlgmr.msra.gmra.mrb[16].mxu0 %v3726_v54  ;;  %2370 = vmatprep.subr.bf16.mxu1 %v1869_v62  ;;  %v4135_v10 = vpop.permute.xlu1 %810 }
 0x221   : > { %2371 = vmatpush3.bf16.msra.mxu1 %v1869_v62  ;;  %2344 = vmatprep.mubr.bf16.mxu0 %v3735_v24 }
 0x224   : > { %2373 = vmatmul.mubr.bf16.vlgmr.msra.gmra.mrb[16].mxu1 %v3726_v54  ;;  %v4137_v54 = vpop.permute.xlu0 %815 }
 0x225   : > { %2376 = vmatprep.mubr.bf16.mxu1 %v3735_v24  ;;  %v4139_v24 = vpop.permute.xlu1 %820 }
 0x228   : > { %2345 = vmatmul.mubr.bf16.gmra.mrb[20].mxu0 %v3762_v41 }
 0x229   : > { %2348 = vmatprep.mubr.bf16.mxu0 %v3771_v28 }
 0x22c   : > { %2377 = vmatmul.mubr.bf16.gmra.mrb[20].mxu1 %v3762_v41  ;;  %v4141_v41 = vpop.permute.xlu0 %825 }
 0x22d   : > { %2380 = vmatprep.mubr.bf16.mxu1 %v3771_v28  ;;  %v4143_v28 = vpop.permute.xlu1 %830 }
 0x230   : > { %2349 = vmatmul.mubr.bf16.gmra.mrb[24].mxu0 %v3804_v22 }
 0x231   : > { %2352 = vmatprep.mubr.bf16.mxu0 %v3810_v5  ;;  %v4155_v21 = vpop.permute.xlu1 %840 }
 0x234   : > { %2381 = vmatmul.mubr.bf16.gmra.mrb[24].mxu1 %v3804_v22  ;;  %v4145_v22 = vpop.permute.xlu0 %835 }
 0x235   : > { %2384 = vmatprep.mubr.bf16.mxu1 %v3810_v5  ;;  %v4164_v14 = vpop.permute.xlu1 %850 }
 0x238   : > { %2353 = vmatmul.mubr.bf16.gmra.mrb[28].mxu0 %v3850_v31  ;;  %v4159_v17 = vpop.permute.xlu0 %845 }
 0x239   : > { %v4175_v19 = vpop.permute.xlu1 %860 }
 0x23c   : > { %2385 = vmatmul.mubr.bf16.gmra.mrb[28].mxu1 %v3850_v31  ;;  %v4167_v53 = vpop.permute.xlu0 %855 }
 0x23d   : > { %v4194_v50 = vpop.permute.xlu1 %870 }
 0x240   : > { %v4177_v58 = vpop.permute.xlu0 %865 }
 0x244   : > { %v4197_v57 = vpop.permute.xlu0 %875 }
 0x266   : > { %v2278_v5 = vpop.f32.mrb[0].mxu0 }
 0x267   : > { %v969_v45 = vadd.f32 %v2278_v5, %v4135_v10  ;;  %v960_v31 = vpop.f32.mrb[1].mxu0 }
 0x268   : > { %v961_v47 = vadd.f32 %v960_v31, %v4131_v18  ;;  %v2279_v44 = vpop.f32.mrb[2].mxu0 }
 0x269   : > { %1025 = vst [vmem:[%s4151_s15 + $0x10] sm:$0xff] %v969_v45  ;;  %v972_v27 = vadd.f32 %v2279_v44, %v4137_v54  ;;  %v963_v1 = vpop.f32.mrb[3].mxu0 }
 0x26a   : > { %1023 = vst [vmem:[%s4151_s15] sm:$0xff] %v961_v47  ;;  %v964_v9 = vadd.f32 %v963_v1, %v4133_v36 }
 0x26b   : > { %1026 = vst [vmem:[%s4151_s15 + $0x18] sm:$0xff] %v972_v27 }
 0x26c   : > { %1024 = vst [vmem:[%s4151_s15 + $0x8] sm:$0xff] %v964_v9 }
 0x26e   : > { %v2282_v38 = vpop.f32.mrb[4].mxu0 }
 0x26f   : > { %v985_v30 = vadd.f32 %v2282_v38, %v4143_v28  ;;  %v976_v48 = vpop.f32.mrb[5].mxu0 }
 0x270   : > { %v977_v61 = vadd.f32 %v976_v48, %v4139_v24  ;;  %v2283_v26 = vpop.f32.mrb[6].mxu0 }
 0x271   : > { %1029 = vst [vmem:[%s4151_s15 + $0x30] sm:$0xff] %v985_v30  ;;  %v988_v60 = vadd.f32 %v2283_v26, %v4145_v22  ;;  %v979_v35 = vpop.f32.mrb[7].mxu0 }
 0x272   : > { %1027 = vst [vmem:[%s4151_s15 + $0x20] sm:$0xff] %v977_v61  ;;  %v980_v40 = vadd.f32 %v979_v35, %v4141_v41 }
 0x273   : > { %1030 = vst [vmem:[%s4151_s15 + $0x38] sm:$0xff] %v988_v60 }
 0x274   : > { %1028 = vst [vmem:[%s4151_s15 + $0x28] sm:$0xff] %v980_v40 }
 0x276   : > { %v2286_v7 = vpop.f32.mrb[8].mxu0 }
 0x277   : > { %v1001_v8 = vadd.f32 %v2286_v7, %v4164_v14  ;;  %v992_v15 = vpop.f32.mrb[9].mxu0 }
 0x278   : > { %v993_v52 = vadd.f32 %v992_v15, %v4155_v21  ;;  %v2310_v20 = vpop.f32.mrb[0].mxu1  ;;  %v2287_v23 = vpop.f32.mrb[10].mxu0 }
 0x279   : > { %1033 = vst [vmem:[%s4151_s15 + $0x50] sm:$0xff] %v1001_v8  ;;  %v1283_v34 = vadd.f32 %v2310_v20, %v4135_v10  ;;  %v1004_v4 = vadd.f32 %v2287_v23, %v4167_v53  ;;  %v1274_v13 = vpop.f32.mrb[1].mxu1  ;;  %v995_v6 = vpop.f32.mrb[11].mxu0 }
 0x27a   : > { %1031 = vst [vmem:[%s4151_s15 + $0x40] sm:$0xff] %v993_v52  ;;  %v1275_v49 = vadd.f32 %v1274_v13, %v4131_v18  ;;  %v996_v39 = vadd.f32 %v995_v6, %v4159_v17  ;;  %v2311_v2 = vpop.f32.mrb[2].mxu1 }
 0x27b   : > { %2108 = vst [vmem:[%s4151_s15 + $0x90] sm:$0xff] %v1283_v34  ;;  %1034 = vst [vmem:[%s4151_s15 + $0x58] sm:$0xff] %v1004_v4  ;;  %v1286_v55 = vadd.f32 %v2311_v2, %v4137_v54  ;;  %v1277_v33 = vpop.f32.mrb[3].mxu1 }
 0x27c   : > { %2106 = vst [vmem:[%s4151_s15 + $0x80] sm:$0xff] %v1275_v49  ;;  %1032 = vst [vmem:[%s4151_s15 + $0x48] sm:$0xff] %v996_v39  ;;  %v1278_v25 = vadd.f32 %v1277_v33, %v4133_v36 }
 0x27d   : > { %2109 = vst [vmem:[%s4151_s15 + $0x98] sm:$0xff] %v1286_v55 }
 0x27e   : > { %2107 = vst [vmem:[%s4151_s15 + $0x88] sm:$0xff] %v1278_v25  ;;  %v2290_v51 = vpop.f32.mrb[12].mxu0 }
 0x27f   : > { %v1017_v42 = vadd.f32 %v2290_v51, %v4194_v50  ;;  %v1008_v32 = vpop.f32.mrb[13].mxu0 }
 0x280   : > { %v1009_v11 = vadd.f32 %v1008_v32, %v4175_v19  ;;  %v2314_v63 = vpop.f32.mrb[4].mxu1  ;;  %v2291_v56 = vpop.f32.mrb[14].mxu0 }
 0x281   : > { %1037 = vst [vmem:[%s4151_s15 + $0x70] sm:$0xff] %v1017_v42  ;;  %v1299_v46 = vadd.f32 %v2314_v63, %v4143_v28  ;;  %v1020_v59 = vadd.f32 %v2291_v56, %v4197_v57  ;;  %v1290_v12 = vpop.f32.mrb[5].mxu1  ;;  %v1011_v29 = vpop.f32.mrb[15].mxu0 }
 0x282   : > { %1035 = vst [vmem:[%s4151_s15 + $0x60] sm:$0xff] %v1009_v11  ;;  %v1291_v16 = vadd.f32 %v1290_v12, %v4139_v24  ;;  %v1012_v3 = vadd.f32 %v1011_v29, %v4177_v58  ;;  %v2315_v0 = vpop.f32.mrb[6].mxu1 }
 0x283   : > { %2112 = vst [vmem:[%s4151_s15 + $0xb0] sm:$0xff] %v1299_v46  ;;  %1038 = vst [vmem:[%s4151_s15 + $0x78] sm:$0xff] %v1020_v59  ;;  %v1302_v37 = vadd.f32 %v2315_v0, %v4145_v22  ;;  %v1293_v43 = vpop.f32.mrb[7].mxu1 }
 0x284   : > { %2110 = vst [vmem:[%s4151_s15 + $0xa0] sm:$0xff] %v1291_v16  ;;  %1036 = vst [vmem:[%s4151_s15 + $0x68] sm:$0xff] %v1012_v3  ;;  %v1294_v62 = vadd.f32 %v1293_v43, %v4141_v41 }
 0x285   : > { %2113 = vst [vmem:[%s4151_s15 + $0xb8] sm:$0xff] %v1302_v37 }
 0x286   : > { %2111 = vst [vmem:[%s4151_s15 + $0xa8] sm:$0xff] %v1294_v62 }
 0x288   : > { %v2318_v5 = vpop.f32.mrb[8].mxu1 }
 0x289   : > { %v1315_v45 = vadd.f32 %v2318_v5, %v4164_v14  ;;  %v1306_v31 = vpop.f32.mrb[9].mxu1 }
 0x28a   : > { %v1307_v47 = vadd.f32 %v1306_v31, %v4155_v21  ;;  %v2319_v44 = vpop.f32.mrb[10].mxu1 }
 0x28b   : > { %2116 = vst [vmem:[%s4151_s15 + $0xd0] sm:$0xff] %v1315_v45  ;;  %v1318_v27 = vadd.f32 %v2319_v44, %v4167_v53  ;;  %v1309_v1 = vpop.f32.mrb[11].mxu1 }
 0x28c   : > { %2114 = vst [vmem:[%s4151_s15 + $0xc0] sm:$0xff] %v1307_v47  ;;  %v1310_v9 = vadd.f32 %v1309_v1, %v4159_v17 }
 0x28d   : > { %2117 = vst [vmem:[%s4151_s15 + $0xd8] sm:$0xff] %v1318_v27 }
 0x28e   : > { %2115 = vst [vmem:[%s4151_s15 + $0xc8] sm:$0xff] %v1310_v9 }
 0x290   : > { %v2322_v38 = vpop.f32.mrb[12].mxu1 }
 0x291   : > { %v1331_v30 = vadd.f32 %v2322_v38, %v4194_v50  ;;  %v1322_v48 = vpop.f32.mrb[13].mxu1 }
 0x292   : > { %v1323_v61 = vadd.f32 %v1322_v48, %v4175_v19  ;;  %v2323_v26 = vpop.f32.mrb[14].mxu1 }
 0x293   : > { %2120 = vst [vmem:[%s4151_s15 + $0xf0] sm:$0xff] %v1331_v30  ;;  %v1334_v60 = vadd.f32 %v2323_v26, %v4197_v57  ;;  %v1325_v35 = vpop.f32.mrb[15].mxu1 }
 0x294   : > { %2118 = vst [vmem:[%s4151_s15 + $0xe0] sm:$0xff] %v1323_v61  ;;  %v1326_v40 = vadd.f32 %v1325_v35, %v4177_v58 }
 0x295   : > { %2121 = vst [vmem:[%s4151_s15 + $0xf8] sm:$0xff] %v1334_v60 }
 0x296   : > { %2119 = vst [vmem:[%s4151_s15 + $0xe8] sm:$0xff] %v1326_v40 }
 0x2f3   : > { %v2342_v7 = vpop.f32.mrb[16].mxu0 }
 0x2f4   : > { %v1598_v8 = vadd.f32 %v2342_v7, %v4135_v10  ;;  %v1589_v15 = vpop.f32.mrb[17].mxu0 }
 0x2f5   : > { %v1590_v52 = vadd.f32 %v1589_v15, %v4131_v18  ;;  %v2343_v20 = vpop.f32.mrb[18].mxu0 }
 0x2f6   : > { %2140 = vst [vmem:[%s4151_s15 + $0x110] sm:$0xff] %v1598_v8  ;;  %v1601_v23 = vadd.f32 %v2343_v20, %v4137_v54  ;;  %v1592_v34 = vpop.f32.mrb[19].mxu0 }
 0x2f7   : > { %2138 = vst [vmem:[%s4151_s15 + $0x100] sm:$0xff] %v1590_v52  ;;  %v1593_v4 = vadd.f32 %v1592_v34, %v4133_v36  ;;  %v2374_v13 = vpop.f32.mrb[16].mxu1 }
 0x2f8   : > { %2141 = vst [vmem:[%s4151_s15 + $0x118] sm:$0xff] %v1601_v23  ;;  %v1913_v6 = vadd.f32 %v2374_v13, %v4135_v10  ;;  %v1904_v49 = vpop.f32.mrb[17].mxu1 }
 0x2f9   : > { %2139 = vst [vmem:[%s4151_s15 + $0x108] sm:$0xff] %v1593_v4  ;;  %v1905_v39 = vadd.f32 %v1904_v49, %v4131_v18  ;;  %v2375_v2 = vpop.f32.mrb[18].mxu1 }
 0x2fa   : > { %2172 = vst [vmem:[%s4151_s15 + $0x190] sm:$0xff] %v1913_v6  ;;  %v1916_v55 = vadd.f32 %v2375_v2, %v4137_v54  ;;  %v1907_v33 = vpop.f32.mrb[19].mxu1 }
 0x2fb   : > { %2170 = vst [vmem:[%s4151_s15 + $0x180] sm:$0xff] %v1905_v39  ;;  %v1908_v25 = vadd.f32 %v1907_v33, %v4133_v36  ;;  %v2346_v51 = vpop.f32.mrb[20].mxu0 }
 0x2fc   : > { %2173 = vst [vmem:[%s4151_s15 + $0x198] sm:$0xff] %v1916_v55  ;;  %v1614_v10 = vadd.f32 %v2346_v51, %v4143_v28  ;;  %v1605_v42 = vpop.f32.mrb[21].mxu0 }
 0x2fd   : > { %2171 = vst [vmem:[%s4151_s15 + $0x188] sm:$0xff] %v1908_v25  ;;  %v1606_v18 = vadd.f32 %v1605_v42, %v4139_v24  ;;  %v2347_v32 = vpop.f32.mrb[22].mxu0 }
 0x2fe   : > { %2144 = vst [vmem:[%s4151_s15 + $0x130] sm:$0xff] %v1614_v10  ;;  %v1617_v54 = vadd.f32 %v2347_v32, %v4145_v22  ;;  %v1608_v11 = vpop.f32.mrb[23].mxu0 }
 0x2ff   : > { %2142 = vst [vmem:[%s4151_s15 + $0x120] sm:$0xff] %v1606_v18  ;;  %v1609_v36 = vadd.f32 %v1608_v11, %v4141_v41  ;;  %v2378_v63 = vpop.f32.mrb[20].mxu1 }
 0x300   : > { %2145 = vst [vmem:[%s4151_s15 + $0x138] sm:$0xff] %v1617_v54  ;;  %v1929_v56 = vadd.f32 %v2378_v63, %v4143_v28  ;;  %v1920_v46 = vpop.f32.mrb[21].mxu1 }
 0x301   : > { %2143 = vst [vmem:[%s4151_s15 + $0x128] sm:$0xff] %v1609_v36  ;;  %v1921_v59 = vadd.f32 %v1920_v46, %v4139_v24  ;;  %v2379_v12 = vpop.f32.mrb[22].mxu1 }
 0x302   : > { %2176 = vst [vmem:[%s4151_s15 + $0x1b0] sm:$0xff] %v1929_v56  ;;  %v1932_v29 = vadd.f32 %v2379_v12, %v4145_v22  ;;  %v1923_v16 = vpop.f32.mrb[23].mxu1 }
 0x303   : > { %2174 = vst [vmem:[%s4151_s15 + $0x1a0] sm:$0xff] %v1921_v59  ;;  %v1924_v3 = vadd.f32 %v1923_v16, %v4141_v41  ;;  %v2350_v0 = vpop.f32.mrb[24].mxu0 }
 0x304   : > { %2177 = vst [vmem:[%s4151_s15 + $0x1b8] sm:$0xff] %v1932_v29  ;;  %v1630_v28 = vadd.f32 %v2350_v0, %v4164_v14  ;;  %v1621_v37 = vpop.f32.mrb[25].mxu0 }
 0x305   : > { %2175 = vst [vmem:[%s4151_s15 + $0x1a8] sm:$0xff] %v1924_v3  ;;  %v1622_v24 = vadd.f32 %v1621_v37, %v4155_v21  ;;  %v2351_v43 = vpop.f32.mrb[26].mxu0 }
 0x306   : > { %2148 = vst [vmem:[%s4151_s15 + $0x150] sm:$0xff] %v1630_v28  ;;  %v1633_v22 = vadd.f32 %v2351_v43, %v4167_v53  ;;  %v1624_v62 = vpop.f32.mrb[27].mxu0 }
 0x307   : > { %2146 = vst [vmem:[%s4151_s15 + $0x140] sm:$0xff] %v1622_v24  ;;  %v1625_v41 = vadd.f32 %v1624_v62, %v4159_v17  ;;  %v2382_v5 = vpop.f32.mrb[24].mxu1 }
 0x308   : > { %2149 = vst [vmem:[%s4151_s15 + $0x158] sm:$0xff] %v1633_v22  ;;  %v1945_v45 = vadd.f32 %v2382_v5, %v4164_v14  ;;  %v1936_v31 = vpop.f32.mrb[25].mxu1 }
 0x309   : > { %2147 = vst [vmem:[%s4151_s15 + $0x148] sm:$0xff] %v1625_v41  ;;  %v1937_v47 = vadd.f32 %v1936_v31, %v4155_v21  ;;  %v2383_v44 = vpop.f32.mrb[26].mxu1 }
 0x30a   : > { %2180 = vst [vmem:[%s4151_s15 + $0x1d0] sm:$0xff] %v1945_v45  ;;  %v1948_v27 = vadd.f32 %v2383_v44, %v4167_v53  ;;  %v1939_v1 = vpop.f32.mrb[27].mxu1 }
 0x30b   : > { %2178 = vst [vmem:[%s4151_s15 + $0x1c0] sm:$0xff] %v1937_v47  ;;  %v1940_v9 = vadd.f32 %v1939_v1, %v4159_v17  ;;  %v2354_v38 = vpop.f32.mrb[28].mxu0 }
 0x30c   : > { %2181 = vst [vmem:[%s4151_s15 + $0x1d8] sm:$0xff] %v1948_v27  ;;  %v1646_v14 = vadd.f32 %v2354_v38, %v4194_v50  ;;  %v1637_v30 = vpop.f32.mrb[29].mxu0 }
 0x30d   : > { %2179 = vst [vmem:[%s4151_s15 + $0x1c8] sm:$0xff] %v1940_v9  ;;  %v1638_v21 = vadd.f32 %v1637_v30, %v4175_v19  ;;  %v2355_v48 = vpop.f32.mrb[30].mxu0 }
 0x30e   : > { %2152 = vst [vmem:[%s4151_s15 + $0x170] sm:$0xff] %v1646_v14  ;;  %v1649_v53 = vadd.f32 %v2355_v48, %v4197_v57  ;;  %v1640_v61 = vpop.f32.mrb[31].mxu0 }
 0x30f   : > { %2150 = vst [vmem:[%s4151_s15 + $0x160] sm:$0xff] %v1638_v21  ;;  %v1641_v17 = vadd.f32 %v1640_v61, %v4177_v58  ;;  %v2386_v26 = vpop.f32.mrb[28].mxu1 }
 0x310   : > { %2153 = vst [vmem:[%s4151_s15 + $0x178] sm:$0xff] %v1649_v53  ;;  %v1961_v60 = vadd.f32 %v2386_v26, %v4194_v50  ;;  %v1952_v35 = vpop.f32.mrb[29].mxu1 }
 0x311   : > { %2151 = vst [vmem:[%s4151_s15 + $0x168] sm:$0xff] %v1641_v17  ;;  %v1953_v40 = vadd.f32 %v1952_v35, %v4175_v19  ;;  %v2387_v7 = vpop.f32.mrb[30].mxu1 }
 0x312   : > { %2184 = vst [vmem:[%s4151_s15 + $0x1f0] sm:$0xff] %v1961_v60  ;;  %v1964_v8 = vadd.f32 %v2387_v7, %v4197_v57  ;;  %v1955_v15 = vpop.f32.mrb[31].mxu1 }
 0x313   : > { %2182 = vst [vmem:[%s4151_s15 + $0x1e0] sm:$0xff] %v1953_v40  ;;  %v1956_v50 = vadd.f32 %v1955_v15, %v4177_v58 }
 0x314   : > { %2185 = vst [vmem:[%s4151_s15 + $0x1f8] sm:$0xff] %v1964_v8 }
 0x315   : > { %2183 = vst [vmem:[%s4151_s15 + $0x1e8] sm:$0xff] %v1956_v50 }
 0x316   : > { %2499 = shalt.err (!%p2496_p2)
}
 0x317   : > { %s2500_s19 = scalar_lea.hbm %s4296_s25, 8192  ;;  %s2504_s14 = scalar_lea.hbm %s4352_s6, 16384 }
 0x318   : > { %p2501_p4 = scmp.ne.s32.totalorder %s4296_s25, %s2500_s19  ;;  %p2505_p9 = scmp.lt.u32.totalorder %s4296_s25, %s4352_s6 }
 0x319   : > { %p2506_p1 = scmp.lt.u32.totalorder %s2504_s14, %s2500_s19  ;;  %p2508_p6 = scmp.lt.u32.totalorder %s2500_s19, %s4296_s25 }
 0x31a   : > { %p2502_p5 = pnand %p2501_p4, %p4571_p11 }
 0x31b   : > { %p2507_p3 = por %p2506_p1, %p2505_p9 }
 0x31c   : > { %p2503_p7 = pneg %p2502_p5 }
 0x31d   : > { %p2509_p12 = por %p2508_p6, %p2507_p3 }
 0x31f   : > { %p2510_p13 = pnand %p2509_p12, %p2503_p7 }
 0x321   : > { %2513 = shalt.err (!%p2510_p13)
}
 0x322   : > { %s2561_s26 = smov 128   ;;  %s2562_s8 = smov 8  }
 0x323   : > { %2390 = dma.vmem_to_hbm [thread:$0]  (%p4571_p11), %s4298_s17, 8192, %s4296_s25, %s1985_s13, %s2561_s26, %s2561_s26, %s2562_s8  }
 0x324 PF: > { %s2014_s28 = sand.u32 1, %s2540_s21   ;;  %p4572_p8 = scmp.ne.s32.totalorder %s4429_s10, 0 }
 0x325   : > { %p4573_p10 = scmp.ge.s32.totalorder %s2552_s24, 2  ;;  %s2015_s12 = scalar_lea.sflag [#allocation4], %s2014_s28 }
 0x327   : > { %p2397_p0 = pnand %p4573_p10, %p4572_p8 }
 0x329   : > { %2535 = dma.done.wait (!%p2397_p0), %s2015_s12, 8192  }
 0x32a   : > { %2537 = vsyncadd (!%p2397_p0), %s2015_s12, 4294959104  ;;  %p19_p2 = scmp.ge.s32.totalorder %s2623_s27, 4   ;;  %s4574_s21 = smov %s2544_s22 }
 0x32b   : > { %s4575_s22 = smov %s2548_s23  ;;  %s4576_s23 = smov %s2635_s30 }
 0x32c   : > { %s4577_s24 = smov %s2623_s27  ;;  %21 = sbr.rel (!%p19_p2) target bundleno = 5 (0x5), region = 95 }
 0x333   :  { %2020 = vsyncpa [#allocation3], 1 }
 0x334   :  { %2022 = vsyncpa [#allocation3 + $0x1], 1 }
 0x335   :  { %2023 = vsyncpa [#allocation4], 1 }
 0x336   :  { %2025 = vsyncpa [#allocation4 + $0x1], 1 }

</bundles_post_ra>
